<compile_context>
chip_gen: v6e
topology: v6e:2x2x1
jax: 0.10.0
libtpu: 0.0.40
codegen_flags: <defaults>
</compile_context>

<pallas_src>
import functools

import jax
import jax.numpy as jnp
from jax.experimental import pallas as pl
from jax.experimental.pallas import tpu as pltpu


def _round_up(x, m):
    return (x + m - 1) // m * m


# ----------------------------------------------------------------------------- Pallas kernel
def _corr_argmax_kernel(a_ref, b_ref, idx_ref, mval_ref, midx_ref, *, tn):
    """One (tm x tn) tile of corr = A @ B plus a running max/argmax over the tn axis."""
    p = pl.program_id(2)

    @pl.when(p == 0)
    def _():
        mval_ref[...] = jnp.full_like(mval_ref, -jnp.inf)
        midx_ref[...] = jnp.zeros_like(midx_ref)

    # (tm, Kpad) bf16 @ (Kpad, tn) bf16 -> (tm, tn) f32 on the MXU.
    corr = jnp.dot(a_ref[...], b_ref[...], preferred_element_type=jnp.float32)

    # In-tile max + first-occurrence argmax (global column index = p * tn + local column).
    col = jax.lax.broadcasted_iota(jnp.int32, corr.shape, 1) + p * tn
    tile_max = jnp.max(corr, axis=1, keepdims=True)                       # (tm, 1)
    tile_idx = jnp.min(jnp.where(corr == tile_max, col, jnp.int32(2 ** 30)),
                       axis=1, keepdims=True)                             # (tm, 1)

    # Cross-tile update: strict '>' so earlier tiles win ties (torch.max first-occurrence).
    better = tile_max > mval_ref[...]
    mval_ref[...] = jnp.where(better, tile_max, mval_ref[...])
    midx_ref[...] = jnp.where(better, tile_idx, midx_ref[...])

    @pl.when(p == pl.num_programs(2) - 1)
    def _():
        idx_ref[...] = midx_ref[...]


def corr_argmax(a, b, tm=256, tn=512):
    """a: (N, Mpad, Kpad) bf16, b: (N, Kpad, Npad) bf16 -> argmax indices (N, Mpad, 1) int32."""
    N, Mpad, Kpad = a.shape
    _, _, Npad = b.shape
    assert Mpad % tm == 0 and Npad % tn == 0
    grid = (N, Mpad // tm, Npad // tn)

    idx = pl.pallas_call(
        functools.partial(_corr_argmax_kernel, tn=tn),
        out_shape=jax.ShapeDtypeStruct((N, Mpad, 1), jnp.int32),
        grid_spec=pltpu.PrefetchScalarGridSpec(
            num_scalar_prefetch=0,
            grid=grid,
            in_specs=[
                pl.BlockSpec((None, tm, Kpad), lambda n, i, p: (n, i, 0)),
                pl.BlockSpec((None, Kpad, tn), lambda n, i, p: (n, 0, p)),
            ],
            out_specs=pl.BlockSpec((None, tm, 1), lambda n, i, p: (n, i, 0)),
            scratch_shapes=[
                pltpu.VMEM((tm, 1), jnp.float32),   # running max value
                pltpu.VMEM((tm, 1), jnp.int32),     # running argmax index
            ],
        ),
        compiler_params=pltpu.CompilerParams(
            dimension_semantics=("parallel", "parallel", "arbitrary")),
    )(a, b)
    return idx


# ----------------------------------------------------------------------------- JAX glue
def _normalize_channels(feat):
    # F.normalize(x.reshape(c, -1), dim=0): unit channel vector per pixel (eps=1e-12).
    norm = jnp.sqrt(jnp.sum(feat * feat, axis=1, keepdims=True))
    return feat / jnp.maximum(norm, 1e-12)


def _extract_patches_batched(feat, patch_size=3, stride=1):
    """feat: (N, C, H, W) -> (N, hh*ww, C*ps*ps); patch m = y*ww + x, k = c*ps*ps + dh*ps + dw."""
    N, C, H, W = feat.shape
    hh = (H - patch_size) // stride + 1
    ww = (W - patch_size) // stride + 1
    views = []
    for dh in range(patch_size):
        for dw in range(patch_size):
            views.append(feat[:, :, dh:dh + stride * hh:stride, dw:dw + stride * ww:stride])
    p = jnp.stack(views, axis=2)                              # (N, C, ps*ps, hh, ww)
    p = p.reshape(N, C * patch_size * patch_size, hh * ww)
    return jnp.transpose(p, (0, 2, 1)), hh, ww                # (N, M, K)


def _build_patch_matrices(feat1, feat2, patch_size, stride):
    f1 = _normalize_channels(feat1)
    f2 = _normalize_channels(feat2)
    A, hh, ww = _extract_patches_batched(f1, patch_size, stride)      # (N, M, K)
    Bp, _, _ = _extract_patches_batched(f2, patch_size, stride)       # (N, M, K)
    # is_norm=True in feature_match_index: per-ref-patch L2 norm, eps = 1e-5.
    Bp = Bp / (jnp.sqrt(jnp.sum(Bp * Bp, axis=2, keepdims=True)) + 1e-5)
    B = jnp.transpose(Bp, (0, 2, 1))                                  # (N, K, M)
    return A, B, hh, ww


def _assemble_output(idx, hh, ww, H, W, patch_size):
    """idx: (N, hh*ww) int32 -> (N, 18, H, W) float32 (flow offsets, 3x3 shifted, reordered)."""
    N = idx.shape[0]
    idx = idx.reshape(N, hh, ww)
    flow_w = (idx % ww).astype(jnp.float32)
    flow_h = (idx // ww).astype(jnp.float32)
    grid_x = jnp.arange(ww, dtype=jnp.float32)[None, None, :]
    grid_y = jnp.arange(hh, dtype=jnp.float32)[None, :, None]
    flow = jnp.stack([flow_w - grid_x, flow_h - grid_y], axis=-1)     # (N, hh, ww, 2)
    pad = patch_size - 1
    flow = jnp.pad(flow, ((0, 0), (0, pad), (0, pad), (0, 0)))        # (N, H, W, 2)

    shifted = []
    for i in range(3):
        for j in range(3):
            s = jnp.pad(flow, ((0, 0), (i, 0), (j, 0), (0, 0)))[:, :H, :W, :]
            shifted.append(s)
    offsets = jnp.stack(shifted, axis=1)                              # (N, 9, H, W, 2)
    # pre[:, 0::2] = offsets[..., 1] (flow_h), pre[:, 1::2] = offsets[..., 0] (flow_w)
    pre = jnp.stack([offsets[..., 1], offsets[..., 0]], axis=2)       # (N, 9, 2, H, W)
    return pre.reshape(N, 18, H, W)


def correspondence_generation(feat1, feat2, patch_size=3, stride=1, tm=256, tn=512):
    """feat1, feat2: (N, C, H, W) float32 -> (N, 18, H, W) float32."""
    N, C, H, W = feat1.shape
    A, B, hh, ww = _build_patch_matrices(feat1, feat2, patch_size, stride)
    M = hh * ww
    K = C * patch_size * patch_size
    n_ref = M

    tn = min(tn, _round_up(n_ref, 128))
    Mpad = _round_up(M, tm)
    Kpad = _round_up(K, 16)           # bf16 sublane granularity only; no 128 round-up needed
    Npad = _round_up(n_ref, tn)

    A_p = jnp.pad(A, ((0, 0), (0, Mpad - M), (0, Kpad - K))).astype(jnp.bfloat16)
    # Pad reference-patch columns by replicating the last valid patch so no in-kernel masking
    # is needed (duplicates lose first-occurrence ties to the original column).
    B_p = jnp.pad(B, ((0, 0), (0, Kpad - K), (0, 0)))
    B_p = jnp.pad(B_p, ((0, 0), (0, 0), (0, Npad - n_ref)), mode="edge").astype(jnp.bfloat16)

    max_idx = corr_argmax(A_p, B_p, tm=tm, tn=tn)     # (N, Mpad, 1) int32
    idx = max_idx[:, :M, 0]                           # (N, M)
    return _assemble_output(idx, hh, ww, H, W, patch_size)


# ----------------------------------------------------------------------------- pure-JAX reference
def reference_forward(feat1, feat2, patch_size=3, stride=1):
    N, C, H, W = feat1.shape
    A, B, hh, ww = _build_patch_matrices(feat1, feat2, patch_size, stride)
    # Same bf16-input / f32-accumulate arithmetic as the kernel so argmax ties cannot flip.
    corr = jnp.einsum("nmk,nkp->nmp",
                      A.astype(jnp.bfloat16), B.astype(jnp.bfloat16),
                      preferred_element_type=jnp.float32)
    idx = jnp.argmax(corr, axis=2).astype(jnp.int32)                  # first occurrence
    return _assemble_output(idx, hh, ww, H, W, patch_size)


def _check(out, ref, tag):
    # Flow components are integer-valued; allow only a vanishing fraction of argmax flips
    # (possible for exact-tie correlations between different MXU code paths).
    mism = float(jnp.mean((jnp.abs(out - ref) > 1e-3).astype(jnp.float32)))
    assert mism < 1e-3, f"{tag}: mismatch fraction {mism}"


if __name__ == "__main__":
    key = jax.random.PRNGKey(0)
    k1, k2, k3, k4 = jax.random.split(key, 4)

    # Primary shapes (matches the module's per-batch NCHW feature maps).
    N, C, H, W = 2, 4, 16, 16
    feat1 = jax.random.normal(k1, (N, C, H, W), jnp.float32)
    feat2 = jax.random.normal(k2, (N, C, H, W), jnp.float32)

    fwd = jax.jit(correspondence_generation)
    out = jax.block_until_ready(fwd(feat1, feat2))
    assert out.shape == (N, 18, H, W) and out.dtype == jnp.float32
    ref = jax.block_until_ready(reference_forward(feat1, feat2))
    _check(out, ref, "16x16")

    # Second case exercises the multi-tile running argmax (several M- and P-tiles).
    feat1b = jax.random.normal(k3, (1, 4, 32, 32), jnp.float32)
    feat2b = jax.random.normal(k4, (1, 4, 32, 32), jnp.float32)
    out_b = jax.block_until_ready(jax.jit(correspondence_generation)(feat1b, feat2b))
    ref_b = jax.block_until_ready(reference_forward(feat1b, feat2b))
    _check(out_b, ref_b, "32x32")

    print("KERNEL_OK")
</pallas_src>

<mosaic_0001>
module attributes {stable_mosaic.version = 11 : i64} {
  func.func @_corr_argmax_kernel(%arg0: i32, %arg1: i32, %arg2: i32, %arg3: memref<1x256x48xbf16, #tpu.memory_space<vmem>>, %arg4: memref<1x48x256xbf16, #tpu.memory_space<vmem>>, %arg5: memref<1x256x1xi32, #tpu.memory_space<vmem>>, %arg6: memref<256x1xf32, #tpu.memory_space<vmem>>, %arg7: memref<256x1xi32, #tpu.memory_space<vmem>>) attributes {dimension_semantics = [#tpu.dimension_semantics<parallel>, #tpu.dimension_semantics<parallel>, #tpu.dimension_semantics<arbitrary>], iteration_bounds = array<i64: 2, 1, 1>, scalar_prefetch = 0 : i64, scratch_operands = 2 : i64, tpu.core_type = #tpu.core_type<tc>, window_params = [{transform_indices = @transform_0, window_bounds = array<i64: 1, 256, 48>}, {transform_indices = @transform_1, window_bounds = array<i64: 1, 48, 256>}, {transform_indices = @transform_2, window_bounds = array<i64: 1, 256, 1>}]} {
    %c0_i32 = arith.constant 0 : i32
    %0 = arith.cmpi eq, %arg2, %c0_i32 : i32
    %1 = arith.extui %0 : i1 to i32
    %c0_i32_0 = arith.constant 0 : i32
    %2 = arith.cmpi ne, %1, %c0_i32_0 : i32
    scf.if %2 {
      %cst_20 = arith.constant 0xFF800000 : f32
      %31 = vector.broadcast %cst_20 : f32 to vector<256x1xf32>
      %c0_21 = arith.constant 0 : index
      %c0_22 = arith.constant 0 : index
      %32 = vector.load %arg6[%c0_21, %c0_22] : memref<256x1xf32, #tpu.memory_space<vmem>>, vector<256x1xf32>
      tpu.vector_store %arg6[%c0_21, %c0_22], %31 {strides = array<i32>} : memref<256x1xf32, #tpu.memory_space<vmem>>, vector<256x1xf32>,
      %c0_i32_23 = arith.constant 0 : i32
      %33 = vector.broadcast %c0_i32_23 : i32 to vector<256x1xi32>
      %c0_24 = arith.constant 0 : index
      %c0_25 = arith.constant 0 : index
      %34 = vector.load %arg7[%c0_24, %c0_25] : memref<256x1xi32, #tpu.memory_space<vmem>>, vector<256x1xi32>
      tpu.vector_store %arg7[%c0_24, %c0_25], %33 {strides = array<i32>} : memref<256x1xi32, #tpu.memory_space<vmem>>, vector<256x1xi32>,
    } else {
    }
    %c0 = arith.constant 0 : index
    %c0_1 = arith.constant 0 : index
    %c0_2 = arith.constant 0 : index
    %3 = vector.load %arg3[%c0, %c0_1, %c0_2] : memref<1x256x48xbf16, #tpu.memory_space<vmem>>, vector<1x256x48xbf16>
    %4 = vector.shape_cast %3 : vector<1x256x48xbf16> to vector<256x48xbf16>
    %c0_3 = arith.constant 0 : index
    %c0_4 = arith.constant 0 : index
    %c0_5 = arith.constant 0 : index
    %5 = vector.load %arg4[%c0_3, %c0_4, %c0_5] : memref<1x48x256xbf16, #tpu.memory_space<vmem>>, vector<1x48x256xbf16>
    %6 = vector.shape_cast %5 : vector<1x48x256xbf16> to vector<48x256xbf16>
    %cst = arith.constant dense<0.000000e+00> : vector<256x256xf32>
    %7 = tpu.matmul %4, %6, %cst {dimension_numbers = #tpu.dot_dimension_numbers<[1], [0], [0], [1], [0, 0, 1, 1], [], []>} : vector<256x48xbf16>, vector<48x256xbf16>, vector<256x256xf32> -> vector<256x256xf32>
    %8 = tpu.iota {dimensions = array<i32: 1>} : vector<256x256xi32>
    %c256_i32 = arith.constant 256 : i32
    %9 = arith.muli %arg2, %c256_i32 : i32
    %10 = vector.broadcast %9 : i32 to vector<256x256xi32>
    %11 = arith.addi %8, %10 : vector<256x256xi32>
    %cst_6 = arith.constant dense<0xFF800000> : vector<256xf32>
    %12 = vector.multi_reduction <maximumf>, %7, %cst_6 [1] : vector<256x256xf32> to vector<256xf32>
    %13 = vector.shape_cast %12 : vector<256xf32> to vector<256x1xf32>
    %14 = vector.broadcast %13 : vector<256x1xf32> to vector<256x256xf32>
    %15 = arith.cmpf oeq, %7, %14 : vector<256x256xf32>
    %c1073741824_i32 = arith.constant 1073741824 : i32
    %16 = vector.broadcast %c1073741824_i32 : i32 to vector<256x256xi32>
    %17 = arith.select %15, %11, %16 : vector<256x256xi1>, vector<256x256xi32>
    %cst_7 = arith.constant dense<2147483647> : vector<256xi32>
    %18 = vector.multi_reduction <minsi>, %17, %cst_7 [1] : vector<256x256xi32> to vector<256xi32>
    %19 = vector.shape_cast %18 : vector<256xi32> to vector<256x1xi32>
    %c0_8 = arith.constant 0 : index
    %c0_9 = arith.constant 0 : index
    %20 = vector.load %arg6[%c0_8, %c0_9] : memref<256x1xf32, #tpu.memory_space<vmem>>, vector<256x1xf32>
    %21 = arith.cmpf ogt, %13, %20 : vector<256x1xf32>
    %c0_10 = arith.constant 0 : index
    %c0_11 = arith.constant 0 : index
    %22 = vector.load %arg6[%c0_10, %c0_11] : memref<256x1xf32, #tpu.memory_space<vmem>>, vector<256x1xf32>
    %23 = arith.select %21, %13, %22 : vector<256x1xi1>, vector<256x1xf32>
    %c0_12 = arith.constant 0 : index
    %c0_13 = arith.constant 0 : index
    %24 = vector.load %arg6[%c0_12, %c0_13] : memref<256x1xf32, #tpu.memory_space<vmem>>, vector<256x1xf32>
    tpu.vector_store %arg6[%c0_12, %c0_13], %23 {strides = array<i32>} : memref<256x1xf32, #tpu.memory_space<vmem>>, vector<256x1xf32>,
    %c0_14 = arith.constant 0 : index
    %c0_15 = arith.constant 0 : index
    %25 = vector.load %arg7[%c0_14, %c0_15] : memref<256x1xi32, #tpu.memory_space<vmem>>, vector<256x1xi32>
    %26 = arith.select %21, %19, %25 : vector<256x1xi1>, vector<256x1xi32>
    %c0_16 = arith.constant 0 : index
    %c0_17 = arith.constant 0 : index
    %27 = vector.load %arg7[%c0_16, %c0_17] : memref<256x1xi32, #tpu.memory_space<vmem>>, vector<256x1xi32>
    tpu.vector_store %arg7[%c0_16, %c0_17], %26 {strides = array<i32>} : memref<256x1xi32, #tpu.memory_space<vmem>>, vector<256x1xi32>,
    %c0_i32_18 = arith.constant 0 : i32
    %28 = arith.cmpi eq, %arg2, %c0_i32_18 : i32
    %29 = arith.extui %28 : i1 to i32
    %c0_i32_19 = arith.constant 0 : i32
    %30 = arith.cmpi ne, %29, %c0_i32_19 : i32
    scf.if %30 {
      %c0_20 = arith.constant 0 : index
      %c0_21 = arith.constant 0 : index
      %31 = vector.load %arg7[%c0_20, %c0_21] : memref<256x1xi32, #tpu.memory_space<vmem>>, vector<256x1xi32>
      %c0_22 = arith.constant 0 : index
      %c0_23 = arith.constant 0 : index
      %c0_24 = arith.constant 0 : index
      %32 = vector.load %arg5[%c0_22, %c0_23, %c0_24] : memref<1x256x1xi32, #tpu.memory_space<vmem>>, vector<1x256x1xi32>
      %33 = vector.shape_cast %32 : vector<1x256x1xi32> to vector<256x1xi32>
      %34 = vector.shape_cast %31 : vector<256x1xi32> to vector<1x256x1xi32>
      tpu.vector_store %arg5[%c0_22, %c0_23, %c0_24], %34 {strides = array<i32>} : memref<1x256x1xi32, #tpu.memory_space<vmem>>, vector<1x256x1xi32>,
    } else {
    }
    return
  }
  func.func @transform_0(%arg0: i32, %arg1: i32, %arg2: i32) -> (i32, i32, i32) {
    %c0_i32 = arith.constant 0 : i32
    %c0_i32_0 = arith.constant 0 : i32
    return %arg0, %arg1, %c0_i32 : i32, i32, i32
  }
  func.func @transform_1(%arg0: i32, %arg1: i32, %arg2: i32) -> (i32, i32, i32) {
    %c0_i32 = arith.constant 0 : i32
    %c0_i32_0 = arith.constant 0 : i32
    return %arg0, %c0_i32, %arg2 : i32, i32, i32
  }
  func.func @transform_2(%arg0: i32, %arg1: i32, %arg2: i32) -> (i32, i32, i32) {
    %c0_i32 = arith.constant 0 : i32
    %c0_i32_0 = arith.constant 0 : i32
    return %arg0, %arg1, %c0_i32 : i32, i32, i32
  }
}

</mosaic_0001>

<bundles_post_ra>
// kernel: correspondence_generation.1
= control target key start
LH: loop header
LB: loop body
LE: loop exit
PB: predicated region body
PF: predicated region fallthrough
CT: control target
= control target key end

     0   :  { %s1980_s9 = smov 0   ;;  %s1982_s10 = smov 0   ;;  %s3693_s0 = inlined_call_operand.vmem [shape: bf16[2,256,48], index: 0, kind: input, shape index: {}]   ;;  %s3694_s1 = inlined_call_operand.vmem [shape: bf16[2,48,256], index: 1, kind: input, shape index: {}]   ;;  %s3695_s2 = inlined_call_operand.vmem [shape: s32[2,256,1], index: 2, kind: output, shape index: {}]  }
   0x1   :  { %s1984_s11 = smov 0  }
   0x2 LB: > { %s31_s12 = sadd.s32 1, %s1957_s10  ;;  %p1833_p0 = scmp.ge.s32.totalorder %s1961_s11, 1  ;;  %s1961_s11 = sphi %s1984_s11, %s12_s11   ;;  %s1957_s10 = sphi %s1982_s10, %s4033_s10   ;;  %s1953_s9 = sphi %s1980_s9, %s4032_s9  }
   0x3   : > { %p33_p1 = scmp.ge.s32.totalorder %s31_s12, 2  ;;  %p157_p2 = scmp.lt.s32.totalorder %s1961_s11, 3 }
   0x5   : > { %s4035_s12 = smov (%p33_p1, %s31_s12), 0  ;;  %p158_p3 = pnand %p1833_p0, %p157_p2 }
   0x7   : > { %161 = sbr.rel (%p158_p3) target bundleno = 752 (0x2f0), region = 28 }
   0xc   : > { %p197_p4 = scmp.lt.s32.totalorder %s1953_s9, 1  ;;  %v1963_v0 = vmov 0   ;;  %vm444_vm0 = vcmask 392192   ;;  %vm231_vm1 = vcmask 7168   ;;  %v1964_v23 = vmov -inf  }
   0xd   : > { %525 = vmatprep.mubr.bf16.mxu0 %v1963_v0  ;;  %605 = vmatprep.mubr.bf16.mxu1 %v1963_v0  ;;  %232 = vst.msk [vmem:[#allocation2] sm:$0xff] %vm231_vm1, %v1964_v23  ;;  %233 = vst.msk [vmem:[#allocation2 + $0x8] sm:$0xff] %vm231_vm1, %v1964_v23 }
   0xe   : > { %s4037_s9 = smov (!%p197_p4, %s1953_s9), 1  ;;  %234 = vst.msk [vmem:[#allocation2 + $0x10] sm:$0xff] %vm231_vm1, %v1964_v23  ;;  %235 = vst.msk [vmem:[#allocation2 + $0x18] sm:$0xff] %vm231_vm1, %v1964_v23 }
   0xf   : > { %s1879_s13 = sshll.u32 %s4037_s9, 7  ;;  %s1887_s14 = smul.u32 48, %s4037_s9  ;;  %236 = vst.msk [vmem:[#allocation2 + $0x20] sm:$0xff] %vm231_vm1, %v1964_v23  ;;  %237 = vst.msk [vmem:[#allocation2 + $0x28] sm:$0xff] %vm231_vm1, %v1964_v23 }
  0x10   : > { %s2007_s17 = scalar_lea.vmem %s3693_s0, %s1879_s13  ;;  %238 = vst.msk [vmem:[#allocation2 + $0x30] sm:$0xff] %vm231_vm1, %v1964_v23  ;;  %239 = vst.msk [vmem:[#allocation2 + $0x38] sm:$0xff] %vm231_vm1, %v1964_v23  ;;  %s1880_s21 = sshll.u32 %s4037_s9, 8 }
  0x11   : > { %s214_s20 = scalar_lea.vmem %s3694_s1, %s1887_s14  ;;  %v1923_v7 = vld [vmem:[%s2007_s17] sm:$0xff]   ;;  %v1925_v9 = vld [vmem:[%s2007_s17 + $0x8] sm:$0xff]   ;;  %v1927_v11 = vld [vmem:[%s2007_s17 + $0x10] sm:$0xff]   ;;  %240 = vst.msk [vmem:[#allocation2 + $0x40] sm:$0xff] %vm231_vm1, %v1964_v23  ;;  %s3466_s24 = scalar_lea.vmem %s3695_s2, %s1880_s21 }
  0x12   : > { %v1914_v1 = vld [vmem:[%s214_s20 + $0x24] ss:$8 sps:$4 sm:$0xff]   ;;  %v1916_v2 = vld [vmem:[%s214_s20 + $0x20] ss:$8 sps:$4 sm:$0xff]   ;;  %v1917_v3 = vld [vmem:[%s214_s20 + $0x14] ss:$8 sps:$4 sm:$0xff]  }
  0x13   : > { %503 = vmatprep.subr.bf16.mxu0 %v1914_v1  ;;  %1881 = vmatprep.subr.bf16.mxu1 %v1914_v1  ;;  %v1919_v4 = vld [vmem:[%s214_s20 + $0x10] ss:$8 sps:$4 sm:$0xff]   ;;  %v1920_v5 = vld [vmem:[%s214_s20 + $0x4] ss:$8 sps:$4 sm:$0xff]   ;;  %v1922_v6 = vld [vmem:[%s214_s20] ss:$8 sps:$4 sm:$0xff]  }
  0x14   : > { %504 = vmatpush1.bf16.msra.mxu0 %v1916_v2  ;;  %1884 = vmatpush1.bf16.msra.mxu1 %v1916_v2  ;;  %v1924_v8 = vld [vmem:[%s2007_s17 + $0x40] sm:$0xff]   ;;  %v1926_v10 = vld [vmem:[%s2007_s17 + $0x48] sm:$0xff]   ;;  %v1928_v12 = vld [vmem:[%s2007_s17 + $0x50] sm:$0xff]   ;;  %241 = vst.msk [vmem:[#allocation2 + $0x48] sm:$0xff] %vm231_vm1, %v1964_v23 }
  0x15   : > { %505 = vmatprep.subr.bf16.mxu0 %v1917_v3  ;;  %1882 = vmatprep.subr.bf16.mxu1 %v1917_v3  ;;  %v1929_v13 = vld [vmem:[%s2007_s17 + $0x18] sm:$0xff]   ;;  %v1931_v15 = vld [vmem:[%s2007_s17 + $0x20] sm:$0xff]   ;;  %v1933_v17 = vld [vmem:[%s2007_s17 + $0x28] sm:$0xff]   ;;  %242 = vst.msk [vmem:[#allocation2 + $0x50] sm:$0xff] %vm231_vm1, %v1964_v23 }
  0x16   : > { %v1930_v14 = vld [vmem:[%s2007_s17 + $0x58] sm:$0xff]   ;;  %v1932_v16 = vld [vmem:[%s2007_s17 + $0x60] sm:$0xff]   ;;  %v1934_v18 = vld [vmem:[%s2007_s17 + $0x68] sm:$0xff]   ;;  %243 = vst.msk [vmem:[#allocation2 + $0x58] sm:$0xff] %vm231_vm1, %v1964_v23 }
  0x17   : > { %v1935_v19 = vld [vmem:[%s2007_s17 + $0x30] sm:$0xff]   ;;  %v1937_v21 = vld [vmem:[%s2007_s17 + $0x38] sm:$0xff]   ;;  %244 = vst.msk [vmem:[#allocation2 + $0x60] sm:$0xff] %vm231_vm1, %v1964_v23  ;;  %245 = vst.msk [vmem:[#allocation2 + $0x68] sm:$0xff] %vm231_vm1, %v1964_v23 }
  0x18   : > { %506 = vmatpush1.bf16.msra.mxu0 %v1919_v4  ;;  %1885 = vmatpush1.bf16.msra.mxu1 %v1919_v4  ;;  %v1936_v20 = vld [vmem:[%s2007_s17 + $0x70] sm:$0xff]   ;;  %v1938_v22 = vld [vmem:[%s2007_s17 + $0x78] sm:$0xff]   ;;  %246 = vst.msk [vmem:[#allocation2 + $0x70] sm:$0xff] %vm231_vm1, %v1964_v23  ;;  %247 = vst.msk [vmem:[#allocation2 + $0x78] sm:$0xff] %vm231_vm1, %v1964_v23 }
  0x19   : > { %507 = vmatprep.subr.bf16.mxu0 %v1920_v5  ;;  %1883 = vmatprep.subr.bf16.mxu1 %v1920_v5  ;;  %248 = vst.msk [vmem:[#allocation2 + $0x80] sm:$0xff] %vm231_vm1, %v1964_v23  ;;  %249 = vst.msk [vmem:[#allocation2 + $0x88] sm:$0xff] %vm231_vm1, %v1964_v23 }
  0x1a   : > { %250 = vst.msk [vmem:[#allocation2 + $0x90] sm:$0xff] %vm231_vm1, %v1964_v23  ;;  %251 = vst.msk [vmem:[#allocation2 + $0x98] sm:$0xff] %vm231_vm1, %v1964_v23 }
  0x1b   : > { %252 = vst.msk [vmem:[#allocation2 + $0xa0] sm:$0xff] %vm231_vm1, %v1964_v23  ;;  %253 = vst.msk [vmem:[#allocation2 + $0xa8] sm:$0xff] %vm231_vm1, %v1964_v23 }
  0x1c   : > { %508 = vmatpush1.bf16.msra.mxu0 %v1922_v6  ;;  %1886 = vmatpush1.bf16.msra.mxu1 %v1922_v6  ;;  %254 = vst.msk [vmem:[#allocation2 + $0xb0] sm:$0xff] %vm231_vm1, %v1964_v23  ;;  %255 = vst.msk [vmem:[#allocation2 + $0xb8] sm:$0xff] %vm231_vm1, %v1964_v23 }
  0x1d   : > { %256 = vst.msk [vmem:[#allocation2 + $0xc0] sm:$0xff] %vm231_vm1, %v1964_v23  ;;  %257 = vst.msk [vmem:[#allocation2 + $0xc8] sm:$0xff] %vm231_vm1, %v1964_v23 }
  0x1e   : > { %258 = vst.msk [vmem:[#allocation2 + $0xd0] sm:$0xff] %vm231_vm1, %v1964_v23  ;;  %259 = vst.msk [vmem:[#allocation2 + $0xd8] sm:$0xff] %vm231_vm1, %v1964_v23 }
  0x1f   : > { %1861 = vmatmul.mubr.msk.bf16.vlgmr.msra.gmra.mxu0 %vm444_vm0, %v1923_v7  ;;  %1869 = vmatmul.mubr.msk.bf16.vlgmr.msra.gmra.mxu1 %vm444_vm0, %v1924_v8  ;;  %260 = vst.msk [vmem:[#allocation2 + $0xe0] sm:$0xff] %vm231_vm1, %v1964_v23  ;;  %261 = vst.msk [vmem:[#allocation2 + $0xe8] sm:$0xff] %vm231_vm1, %v1964_v23 }
  0x20   : > { %535 = vmatprep.mubr.bf16.mxu0 %v1963_v0  ;;  %615 = vmatprep.mubr.bf16.mxu1 %v1963_v0  ;;  %262 = vst.msk [vmem:[#allocation2 + $0xf0] sm:$0xff] %vm231_vm1, %v1964_v23  ;;  %263 = vst.msk [vmem:[#allocation2 + $0xf8] sm:$0xff] %vm231_vm1, %v1964_v23 }
  0x21   : > { %264 = vst.msk [vmem:[#allocation3] sm:$0xff] %vm231_vm1, %v1963_v0  ;;  %265 = vst.msk [vmem:[#allocation3 + $0x8] sm:$0xff] %vm231_vm1, %v1963_v0 }
  0x22   : > { %266 = vst.msk [vmem:[#allocation3 + $0x10] sm:$0xff] %vm231_vm1, %v1963_v0  ;;  %267 = vst.msk [vmem:[#allocation3 + $0x18] sm:$0xff] %vm231_vm1, %v1963_v0 }
  0x23   : > { %268 = vst.msk [vmem:[#allocation3 + $0x20] sm:$0xff] %vm231_vm1, %v1963_v0  ;;  %269 = vst.msk [vmem:[#allocation3 + $0x28] sm:$0xff] %vm231_vm1, %v1963_v0 }
  0x24   : > { %270 = vst.msk [vmem:[#allocation3 + $0x30] sm:$0xff] %vm231_vm1, %v1963_v0  ;;  %271 = vst.msk [vmem:[#allocation3 + $0x38] sm:$0xff] %vm231_vm1, %v1963_v0 }
  0x25   : > { %272 = vst.msk [vmem:[#allocation3 + $0x40] sm:$0xff] %vm231_vm1, %v1963_v0  ;;  %273 = vst.msk [vmem:[#allocation3 + $0x48] sm:$0xff] %vm231_vm1, %v1963_v0 }
  0x26   : > { %274 = vst.msk [vmem:[#allocation3 + $0x50] sm:$0xff] %vm231_vm1, %v1963_v0  ;;  %275 = vst.msk [vmem:[#allocation3 + $0x58] sm:$0xff] %vm231_vm1, %v1963_v0 }
  0x27   : > { %1862 = vmatmul.mubr.msk.bf16.gmra.mxu0 %vm444_vm0, %v1925_v9  ;;  %1870 = vmatmul.mubr.msk.bf16.gmra.mxu1 %vm444_vm0, %v1926_v10  ;;  %276 = vst.msk [vmem:[#allocation3 + $0x60] sm:$0xff] %vm231_vm1, %v1963_v0  ;;  %277 = vst.msk [vmem:[#allocation3 + $0x68] sm:$0xff] %vm231_vm1, %v1963_v0 }
  0x28   : > { %545 = vmatprep.mubr.bf16.mxu0 %v1963_v0  ;;  %625 = vmatprep.mubr.bf16.mxu1 %v1963_v0  ;;  %278 = vst.msk [vmem:[#allocation3 + $0x70] sm:$0xff] %vm231_vm1, %v1963_v0  ;;  %279 = vst.msk [vmem:[#allocation3 + $0x78] sm:$0xff] %vm231_vm1, %v1963_v0 }
  0x29   : > { %280 = vst.msk [vmem:[#allocation3 + $0x80] sm:$0xff] %vm231_vm1, %v1963_v0  ;;  %281 = vst.msk [vmem:[#allocation3 + $0x88] sm:$0xff] %vm231_vm1, %v1963_v0 }
  0x2a   : > { %282 = vst.msk [vmem:[#allocation3 + $0x90] sm:$0xff] %vm231_vm1, %v1963_v0  ;;  %283 = vst.msk [vmem:[#allocation3 + $0x98] sm:$0xff] %vm231_vm1, %v1963_v0 }
  0x2b   : > { %284 = vst.msk [vmem:[#allocation3 + $0xa0] sm:$0xff] %vm231_vm1, %v1963_v0  ;;  %285 = vst.msk [vmem:[#allocation3 + $0xa8] sm:$0xff] %vm231_vm1, %v1963_v0 }
  0x2c   : > { %286 = vst.msk [vmem:[#allocation3 + $0xb0] sm:$0xff] %vm231_vm1, %v1963_v0  ;;  %287 = vst.msk [vmem:[#allocation3 + $0xb8] sm:$0xff] %vm231_vm1, %v1963_v0 }
  0x2d   : > { %288 = vst.msk [vmem:[#allocation3 + $0xc0] sm:$0xff] %vm231_vm1, %v1963_v0  ;;  %289 = vst.msk [vmem:[#allocation3 + $0xc8] sm:$0xff] %vm231_vm1, %v1963_v0 }
  0x2e   : > { %290 = vst.msk [vmem:[#allocation3 + $0xd0] sm:$0xff] %vm231_vm1, %v1963_v0  ;;  %291 = vst.msk [vmem:[#allocation3 + $0xd8] sm:$0xff] %vm231_vm1, %v1963_v0 }
  0x2f   : > { %1863 = vmatmul.mubr.msk.bf16.gmra.mxu0 %vm444_vm0, %v1927_v11  ;;  %1871 = vmatmul.mubr.msk.bf16.gmra.mxu1 %vm444_vm0, %v1928_v12  ;;  %292 = vst.msk [vmem:[#allocation3 + $0xe0] sm:$0xff] %vm231_vm1, %v1963_v0  ;;  %293 = vst.msk [vmem:[#allocation3 + $0xe8] sm:$0xff] %vm231_vm1, %v1963_v0 }
  0x30   : > { %555 = vmatprep.mubr.bf16.mxu0 %v1963_v0  ;;  %635 = vmatprep.mubr.bf16.mxu1 %v1963_v0  ;;  %294 = vst.msk [vmem:[#allocation3 + $0xf0] sm:$0xff] %vm231_vm1, %v1963_v0  ;;  %295 = vst.msk [vmem:[#allocation3 + $0xf8] sm:$0xff] %vm231_vm1, %v1963_v0 }
  0x37   : > { %1864 = vmatmul.mubr.msk.bf16.gmra.mxu0 %vm444_vm0, %v1929_v13  ;;  %1872 = vmatmul.mubr.msk.bf16.gmra.mxu1 %vm444_vm0, %v1930_v14 }
  0x38   : > { %565 = vmatprep.mubr.bf16.mxu0 %v1963_v0  ;;  %645 = vmatprep.mubr.bf16.mxu1 %v1963_v0 }
  0x3f   : > { %1865 = vmatmul.mubr.msk.bf16.gmra.mxu0 %vm444_vm0, %v1931_v15  ;;  %1873 = vmatmul.mubr.msk.bf16.gmra.mxu1 %vm444_vm0, %v1932_v16 }
  0x40   : > { %575 = vmatprep.mubr.bf16.mxu0 %v1963_v0  ;;  %655 = vmatprep.mubr.bf16.mxu1 %v1963_v0 }
  0x47   : > { %1866 = vmatmul.mubr.msk.bf16.gmra.mxu0 %vm444_vm0, %v1933_v17  ;;  %1874 = vmatmul.mubr.msk.bf16.gmra.mxu1 %vm444_vm0, %v1934_v18 }
  0x48   : > { %585 = vmatprep.mubr.bf16.mxu0 %v1963_v0  ;;  %665 = vmatprep.mubr.bf16.mxu1 %v1963_v0 }
  0x4f   : > { %1867 = vmatmul.mubr.msk.bf16.gmra.mxu0 %vm444_vm0, %v1935_v19  ;;  %1875 = vmatmul.mubr.msk.bf16.gmra.mxu1 %vm444_vm0, %v1936_v20 }
  0x50   : > { %595 = vmatprep.mubr.bf16.mxu0 %v1963_v0  ;;  %675 = vmatprep.mubr.bf16.mxu1 %v1963_v0 }
  0x57   : > { %1868 = vmatmul.mubr.msk.bf16.gmra.mxu0 %vm444_vm0, %v1937_v21  ;;  %1876 = vmatmul.mubr.msk.bf16.gmra.mxu1 %vm444_vm0, %v1938_v22 }
  0xdf   : > { %v2154_v24 = vpop.f32.mrf.mxu0  ;;  %v2156_v25 = vpop.f32.mrf.mxu1 }
  0xe1   : > { %v2158_v26 = vpop.f32.mrf.mxu0  ;;  %v2160_v27 = vpop.f32.mrf.mxu1 }
  0xe2   : > { %v693_v28 = vmax.f32 %v2154_v24, %v2158_v26  ;;  %v741_v34 = vmax.f32 %v2156_v25, %v2160_v27 }
  0xe3   : > { %v2164_v29 = vpop.f32.mrf.mxu0  ;;  %v2166_v30 = vpop.f32.mrf.mxu1 }
  0xe4   : > { %694 = vmax.xlane.f32.xlu0 %v693_v28 }
  0xe5   : > { %v2168_v31 = vpop.f32.mrf.mxu0  ;;  %v2170_v32 = vpop.f32.mrf.mxu1 }
  0xe6   : > { %v744_v33 = vmax.f32 %v2166_v30, %v2170_v32  ;;  %v696_v39 = vmax.f32 %v2164_v29, %v2168_v31 }
  0xe7   : > { %v2176_v35 = vpop.f32.mrf.mxu0  ;;  %v2178_v36 = vpop.f32.mrf.mxu1 }
  0xe8   : > { %745 = vmax.xlane.f32.xlu1 %v744_v33  ;;  %742 = vmax.xlane.f32.xlu0 %v741_v34 }
  0xe9   : > { %v2180_v37 = vpop.f32.mrf.mxu0  ;;  %v2182_v38 = vpop.f32.mrf.mxu1 }
  0xea   : > { %v699_v40 = vmax.f32 %v2176_v35, %v2180_v37  ;;  %v747_v43 = vmax.f32 %v2178_v36, %v2182_v38 }
  0xeb   : > { %v2188_v41 = vpop.f32.mrf.mxu0  ;;  %v2190_v42 = vpop.f32.mrf.mxu1 }
  0xec   : > { %697 = vmax.xlane.f32.xlu0 %v696_v39  ;;  %700 = vmax.xlane.f32.xlu1 %v699_v40 }
  0xed   : > { %v2194_v44 = vpop.f32.mrf.mxu0  ;;  %v2196_v45 = vpop.f32.mrf.mxu1 }
  0xee   : > { %v702_v46 = vmax.f32 %v2188_v41, %v2194_v44  ;;  %v750_v51 = vmax.f32 %v2190_v42, %v2196_v45 }
  0xef   : > { %v2200_v47 = vpop.f32.mrf.mxu0  ;;  %v2202_v48 = vpop.f32.mrf.mxu1 }
  0xf0   : > { %748 = vmax.xlane.f32.xlu0 %v747_v43  ;;  %703 = vmax.xlane.f32.xlu1 %v702_v46 }
  0xf1   : > { %v2204_v49 = vpop.f32.mrf.mxu0  ;;  %v2206_v50 = vpop.f32.mrf.mxu1 }
  0xf2   : > { %v705_v52 = vmax.f32 %v2200_v47, %v2204_v49  ;;  %v753_v55 = vmax.f32 %v2202_v48, %v2206_v50 }
  0xf3   : > { %v2212_v53 = vpop.f32.mrf.mxu0  ;;  %v2214_v54 = vpop.f32.mrf.mxu1 }
  0xf4   : > { %751 = vmax.xlane.f32.xlu1 %v750_v51  ;;  %706 = vmax.xlane.f32.xlu0 %v705_v52 }
  0xf5   : > { %v2218_v56 = vpop.f32.mrf.mxu0  ;;  %v2220_v57 = vpop.f32.mrf.mxu1 }
  0xf6   : > { %v708_v58 = vmax.f32 %v2212_v53, %v2218_v56  ;;  %v756_v63 = vmax.f32 %v2214_v54, %v2220_v57 }
  0xf7   : > { %v2224_v59 = vpop.f32.mrf.mxu0  ;;  %v2226_v60 = vpop.f32.mrf.mxu1 }
  0xf8   : > { %754 = vmax.xlane.f32.xlu0 %v753_v55  ;;  %709 = vmax.xlane.f32.xlu1 %v708_v58 }
  0xf9   : > { %v2228_v61 = vpop.f32.mrf.mxu0  ;;  %v2230_v62 = vpop.f32.mrf.mxu1 }
  0xfa   : > { %v711_v0 = vmax.f32 %v2224_v59, %v2228_v61  ;;  %v759_v3 = vmax.f32 %v2226_v60, %v2230_v62 }
  0xfb   : > { %v2236_v1 = vpop.f32.mrf.mxu0  ;;  %v2238_v2 = vpop.f32.mrf.mxu1 }
  0xfc   : > { %757 = vmax.xlane.f32.xlu1 %v756_v63  ;;  %712 = vmax.xlane.f32.xlu0 %v711_v0 }
  0xfd   : > { %v2242_v4 = vpop.f32.mrf.mxu0  ;;  %v2244_v5 = vpop.f32.mrf.mxu1 }
  0xfe   : > { %v714_v6 = vmax.f32 %v2236_v1, %v2242_v4  ;;  %v762_v11 = vmax.f32 %v2238_v2, %v2244_v5 }
  0xff   : > { %v2248_v7 = vpop.f32.mrf.mxu0  ;;  %v2250_v8 = vpop.f32.mrf.mxu1 }
 0x100   : > { %760 = vmax.xlane.f32.xlu0 %v759_v3  ;;  %715 = vmax.xlane.f32.xlu1 %v714_v6 }
 0x101   : > { %v2252_v9 = vpop.f32.mrf.mxu0  ;;  %v2254_v10 = vpop.f32.mrf.mxu1 }
 0x102   : > { %v717_v12 = vmax.f32 %v2248_v7, %v2252_v9  ;;  %v765_v15 = vmax.f32 %v2250_v8, %v2254_v10 }
 0x103   : > { %v2260_v13 = vpop.f32.mrf.mxu0  ;;  %v2262_v14 = vpop.f32.mrf.mxu1 }
 0x104   : > { %763 = vmax.xlane.f32.xlu1 %v762_v11  ;;  %718 = vmax.xlane.f32.xlu0 %v717_v12 }
 0x105   : > { %v2266_v16 = vpop.f32.mrf.mxu0  ;;  %v2268_v17 = vpop.f32.mrf.mxu1 }
 0x106   : > { %v720_v18 = vmax.f32 %v2260_v13, %v2266_v16  ;;  %v768_v23 = vmax.f32 %v2262_v14, %v2268_v17 }
 0x107   : > { %v2272_v19 = vpop.f32.mrf.mxu0  ;;  %v2274_v20 = vpop.f32.mrf.mxu1 }
 0x108   : > { %766 = vmax.xlane.f32.xlu0 %v765_v15  ;;  %721 = vmax.xlane.f32.xlu1 %v720_v18 }
 0x109   : > { %v2276_v21 = vpop.f32.mrf.mxu0  ;;  %v2278_v22 = vpop.f32.mrf.mxu1 }
 0x10a   : > { %v723_v28 = vmax.f32 %v2272_v19, %v2276_v21  ;;  %v771_v39 = vmax.f32 %v2274_v20, %v2278_v22 }
 0x10b   : > { %v2284_v33 = vpop.f32.mrf.mxu0  ;;  %v2286_v34 = vpop.f32.mrf.mxu1 }
 0x10c   : > { %769 = vmax.xlane.f32.xlu1 %v768_v23  ;;  %724 = vmax.xlane.f32.xlu0 %v723_v28 }
 0x10d   : > { %v2290_v40 = vpop.f32.mrf.mxu0  ;;  %v2292_v43 = vpop.f32.mrf.mxu1 }
 0x10e   : > { %v726_v46 = vmax.f32 %v2284_v33, %v2290_v40  ;;  %v774_v63 = vmax.f32 %v2286_v34, %v2292_v43 }
 0x10f   : > { %v2296_v51 = vpop.f32.mrf.mxu0  ;;  %v2298_v52 = vpop.f32.mrf.mxu1 }
 0x110   : > { %3825 = vst [vmem:[#allocation4_spill] sm:$0xff] %v2298_v52  ;;  %772 = vmax.xlane.f32.xlu0 %v771_v39  ;;  %727 = vmax.xlane.f32.xlu1 %v726_v46 }
 0x111   : > { %v2300_v55 = vpop.f32.mrf.mxu0  ;;  %v2302_v58 = vpop.f32.mrf.mxu1 }
 0x112   : > { %3826 = vst [vmem:[#allocation5_spill] sm:$0xff] %v2302_v58  ;;  %v729_v0 = vmax.f32 %v2296_v51, %v2300_v55  ;;  %v777_v11 = vmax.f32 %v2298_v52, %v2302_v58 }
 0x113   : > { %v2308_v3 = vpop.f32.mrf.mxu0  ;;  %v2310_v6 = vpop.f32.mrf.mxu1 }
 0x114   : > { %3827 = vst [vmem:[#allocation6_spill] sm:$0xff] %v2308_v3  ;;  %3828 = vst [vmem:[#allocation7_spill] sm:$0xff] %v2310_v6  ;;  %775 = vmax.xlane.f32.xlu1 %v774_v63  ;;  %730 = vmax.xlane.f32.xlu0 %v729_v0 }
 0x115   : > { %v2314_v12 = vpop.f32.mrf.mxu0  ;;  %v2316_v15 = vpop.f32.mrf.mxu1 }
 0x116   : > { %3829 = vst [vmem:[#allocation8_spill] sm:$0xff] %v2314_v12  ;;  %3830 = vst [vmem:[#allocation9_spill] sm:$0xff] %v2316_v15  ;;  %v732_v18 = vmax.f32 %v2308_v3, %v2314_v12  ;;  %v780_v63 = vmax.f32 %v2310_v6, %v2316_v15  ;;  %v686_v6 = vlaneseq }
 0x117   : > { %v2320_v23 = vpop.f32.mrf.mxu0  ;;  %v2322_v28 = vpop.f32.mrf.mxu1 }
 0x118   : > { %778 = vmax.xlane.f32.xlu0 %v777_v11  ;;  %733 = vmax.xlane.f32.xlu1 %v732_v18 }
 0x119   : > { %v2324_v39 = vpop.f32.mrf.mxu0  ;;  %v2326_v46 = vpop.f32.mrf.mxu1 }
 0x11a   : > { %3831 = vst [vmem:[#allocation10_spill] sm:$0xff] %v2324_v39  ;;  %3832 = vst [vmem:[#allocation11_spill] sm:$0xff] %v2326_v46  ;;  %v735_v0 = vmax.f32 %v2320_v23, %v2324_v39  ;;  %v783_v11 = vmax.f32 %v2322_v28, %v2326_v46  ;;  %v2346_v39 = vand.u32 127, %v686_v6 }
 0x11b   : > { %v2332_v58 = vpop.f32.mrf.mxu0  ;;  %v2334_v52 = vpop.f32.mrf.mxu1 }
 0x11c   : > { %3833 = vst [vmem:[#allocation12_spill] sm:$0xff] %v2334_v52  ;;  %781 = vmax.xlane.f32.xlu1 %v780_v63  ;;  %736 = vmax.xlane.f32.xlu0 %v735_v0  ;;  %v2348_v63 = vld [vmem:[#allocation2] sm:$0xff]  ;;  %v2351_v0 = vadd.s32 128, %v2346_v39 }
 0x11d   : > { %v2338_v18 = vpop.f32.mrf.mxu0  ;;  %v2342_v3 = vpop.f32.mrf.mxu1  ;;  %3836 = vst [vmem:[#allocation15_spill] sm:$0xff] %v2348_v63 }
 0x11e   : > { %3834 = vst [vmem:[#allocation13_spill] sm:$0xff] %v2338_v18  ;;  %v738_v12 = vmax.f32 %v2332_v58, %v2338_v18  ;;  %3835 = vst [vmem:[#allocation14_spill] sm:$0xff] %v2342_v3  ;;  %v786_v15 = vmax.f32 %v2334_v52, %v2342_v3 }
 0x120   : > { %784 = vmax.xlane.f32.xlu0 %v783_v11  ;;  %739 = vmax.xlane.f32.xlu1 %v738_v12  ;;  %v2366_v12 = vld [vmem:[#allocation2 + $0x88] sm:$0xff] }
 0x121   : > { %3838 = vst [vmem:[#allocation17_spill] sm:$0xff] %v2366_v12 }
 0x124   : > { %787 = vmax.xlane.f32.xlu1 %v786_v15 }
 0x16d   : > { %v2353_v46 = vpop.xlane.xlu0 %694 }
 0x16e   : > { %3837 = vst [vmem:[#allocation16_spill] sm:$0xff] %v2353_v46  ;;  %vm789_vm2 = vcmp.eq.f32.partialorder %v2154_v24, %v2353_v46  ;;  %vm790_vm3 = vcmp.eq.f32.partialorder %v2158_v26, %v2353_v46  ;;  %vm3808_vm4 = vcmp.gt.f32.partialorder %v2353_v46, %v2348_v63  ;;  %v2371_v24 = vld [vmem:[#allocation2 + $0x80] sm:$0xff] }
 0x16f   : > { %v1493_v6 = vsel %vm3808_vm4, %v2353_v46, %v2348_v63  ;;  %v853_v15 = vsel %vm789_vm2, %v2346_v39, 1073741824  ;;  %v854_v11 = vsel %vm790_vm3, %v2351_v0, 1073741824  ;;  %3839 = vst [vmem:[#allocation18_spill] sm:$0xff] %v2371_v24  ;;  %v2405_v63 = vld [vmem:[#allocation2 + $0x10] sm:$0xff] }
 0x170   : > { %1526 = vst.msk [vmem:[#allocation2] sm:$0xff] %vm231_vm1, %v1493_v6  ;;  %vm917_vm5 = vcmp.lt.s32.totalorder %v853_v15, %v854_v11  ;;  %3844 = vst [vmem:[#allocation23_spill] sm:$0xff] %v2405_v63 }
 0x171   : > { %v2373_v26 = vpop.xlane.xlu1 %745  ;;  %v2375_v3 = vpop.xlane.xlu0 %742  ;;  %v2377_v52 = vsel %vm917_vm5, %v853_v15, %v854_v11  ;;  %v2396_v15 = vld [vmem:[#allocation2 + $0x8] sm:$0xff] }
 0x172   : > { %3840 = vst [vmem:[#allocation19_spill] sm:$0xff] %v2373_v26  ;;  %3841 = vst [vmem:[#allocation20_spill] sm:$0xff] %v2375_v3  ;;  %vm823_vm6 = vcmp.eq.f32.partialorder %v2166_v30, %v2373_v26  ;;  %vm824_vm7 = vcmp.eq.f32.partialorder %v2170_v32, %v2373_v26  ;;  %vm3767_vm8 = vcmp.gt.f32.partialorder %v2373_v26, %v2366_v12  ;;  %v920_v11 = vshra.s32 %v2377_v52, 16  ;;  %v2442_v32 = vld [vmem:[#allocation2 + $0x90] sm:$0xff] }
 0x173   : > { %3842 = vst [vmem:[#allocation21_spill] sm:$0xff] %v2377_v52  ;;  %vm821_vm9 = vcmp.eq.f32.partialorder %v2156_v25, %v2375_v3  ;;  %v1510_v6 = vsel %vm3767_vm8, %v2373_v26, %v2366_v12  ;;  %vm822_vm10 = vcmp.eq.f32.partialorder %v2160_v27, %v2375_v3  ;;  %vm3800_vm11 = vcmp.gt.f32.partialorder %v2375_v3, %v2371_v24 }
 0x174   : > { %3843 = vst [vmem:[#allocation22_spill] sm:$0xff] %v2396_v15  ;;  %1543 = vst.msk [vmem:[#allocation2 + $0x88] sm:$0xff] %vm231_vm1, %v1510_v6  ;;  %v1509_v25 = vsel %vm3800_vm11, %v2375_v3, %v2371_v24  ;;  %v885_v12 = vsel %vm821_vm9, %v2346_v39, 1073741824  ;;  %v886_v27 = vsel %vm822_vm10, %v2351_v0, 1073741824  ;;  %v2414_v52 = vcvt.s32.f32 %v920_v11 }
 0x175   : > { %1542 = vst.msk [vmem:[#allocation2 + $0x80] sm:$0xff] %vm231_vm1, %v1509_v25  ;;  %v2410_v46 = vpop.xlane.xlu0 %697  ;;  %v2412_v18 = vpop.xlane.xlu1 %700  ;;  %vm1173_vm12 = vcmp.lt.s32.totalorder %v885_v12, %v886_v27  ;;  %v887_v6 = vsel %vm823_vm6, %v2346_v39, 1073741824  ;;  %v888_v24 = vsel %vm824_vm7, %v2351_v0, 1073741824  ;;  %3847 = vst [vmem:[#allocation26_spill] sm:$0xff] %v2442_v32  ;;  %v2452_v25 = vld [vmem:[#allocation2 + $0x18] sm:$0xff] }
 0x176   : > { %3845 = vst [vmem:[#allocation24_spill] sm:$0xff] %v2410_v46  ;;  %3846 = vst [vmem:[#allocation25_spill] sm:$0xff] %v2412_v18  ;;  %vm791_vm13 = vcmp.eq.f32.partialorder %v2164_v29, %v2410_v46  ;;  %vm792_vm14 = vcmp.eq.f32.partialorder %v2168_v31, %v2410_v46  ;;  %vm3789_vm15 = vcmp.gt.f32.partialorder %v2410_v46, %v2396_v15  ;;  %923 = vmin.xlane.f32.xlu0 %v2414_v52 }
 0x177   : > { %vm793_vm0 = vcmp.eq.f32.partialorder %v2176_v35, %v2412_v18  ;;  %v1494_v30 = vsel %vm3789_vm15, %v2410_v46, %v2396_v15  ;;  %vm794_vm2 = vcmp.eq.f32.partialorder %v2180_v37, %v2412_v18  ;;  %vm3798_vm3 = vcmp.gt.f32.partialorder %v2412_v18, %v2405_v63  ;;  %3849 = vst [vmem:[#allocation28_spill] sm:$0xff] %v2452_v25 }
 0x178   : > { %v2444_v11 = vsel %vm1173_vm12, %v885_v12, %v886_v27  ;;  %1527 = vst.msk [vmem:[#allocation2 + $0x8] sm:$0xff] %vm231_vm1, %v1494_v30  ;;  %v1495_v35 = vsel %vm3798_vm3, %v2412_v18, %v2405_v63  ;;  %v857_v26 = vsel %vm793_vm0, %v2346_v39, 1073741824  ;;  %v858_v15 = vsel %vm794_vm2, %v2351_v0, 1073741824  ;;  %v2493_v18 = vld [vmem:[#allocation2 + $0x20] sm:$0xff] }
 0x179   : > { %3848 = vst [vmem:[#allocation27_spill] sm:$0xff] %v2444_v11  ;;  %v1176_v37 = vshra.s32 %v2444_v11, 16  ;;  %1528 = vst.msk [vmem:[#allocation2 + $0x10] sm:$0xff] %vm231_vm1, %v1495_v35  ;;  %v2458_v12 = vpop.xlane.xlu0 %748  ;;  %v2460_v27 = vpop.xlane.xlu1 %703  ;;  %vm949_vm5 = vcmp.lt.s32.totalorder %v857_v26, %v858_v15  ;;  %v855_v30 = vsel %vm791_vm13, %v2346_v39, 1073741824  ;;  %v856_v63 = vsel %vm792_vm14, %v2351_v0, 1073741824  ;;  %v2485_v35 = vld [vmem:[#allocation2 + $0x98] sm:$0xff] }
 0x17a   : > { %3850 = vst [vmem:[#allocation29_spill] sm:$0xff] %v2458_v12  ;;  %3851 = vst [vmem:[#allocation30_spill] sm:$0xff] %v2460_v27  ;;  %vm825_vm6 = vcmp.eq.f32.partialorder %v2178_v36, %v2458_v12  ;;  %vm826_vm7 = vcmp.eq.f32.partialorder %v2182_v38, %v2458_v12  ;;  %vm3768_vm9 = vcmp.gt.f32.partialorder %v2458_v12, %v2442_v32 }
 0x17b   : > { %v1511_v29 = vsel %vm3768_vm9, %v2458_v12, %v2442_v32  ;;  %vm3760_vm10 = vcmp.gt.f32.partialorder %v2460_v27, %v2452_v25  ;;  %v2483_v31 = vcvt.s32.f32 %v1176_v37  ;;  %3852 = vst [vmem:[#allocation31_spill] sm:$0xff] %v2485_v35  ;;  %vm1189_vm12 = vcmp.lt.s32.totalorder %v887_v6, %v888_v24  ;;  %3853 = vst [vmem:[#allocation32_spill] sm:$0xff] %v2493_v18 }
 0x17c   : > { %1544 = vst.msk [vmem:[#allocation2 + $0x90] sm:$0xff] %vm231_vm1, %v1511_v29  ;;  %v1496_v46 = vsel %vm3760_vm10, %v2460_v27, %v2452_v25  ;;  %v2495_v3 = vsel %vm949_vm5, %v857_v26, %v858_v15  ;;  %vm933_vm13 = vcmp.lt.s32.totalorder %v855_v30, %v856_v63  ;;  %v889_v25 = vsel %vm825_vm6, %v2346_v39, 1073741824  ;;  %v2534_v26 = vld [vmem:[#allocation2 + $0xa0] sm:$0xff] }
 0x17d   : > { %1529 = vst.msk [vmem:[#allocation2 + $0x18] sm:$0xff] %vm231_vm1, %v1496_v46  ;;  %1179 = vmin.xlane.f32.xlu0 %v2483_v31  ;;  %v2499_v37 = vpop.xlane.xlu1 %751  ;;  %v2501_v32 = vpop.xlane.xlu0 %706  ;;  %v952_v29 = vshra.s32 %v2495_v3, 16  ;;  %v2504_v11 = vsel %vm933_vm13, %v855_v30, %v856_v63  ;;  %v890_v46 = vsel %vm826_vm7, %v2351_v0, 1073741824  ;;  %vm795_vm14 = vcmp.eq.f32.partialorder %v2188_v41, %v2460_v27  ;;  %3857 = vst [vmem:[#allocation36_spill] sm:$0xff] %v2534_v26 }
 0x17e   : > { %3854 = vst [vmem:[#allocation33_spill] sm:$0xff] %v2499_v37  ;;  %3855 = vst [vmem:[#allocation34_spill] sm:$0xff] %v2501_v32  ;;  %vm3735_vm0 = vcmp.gt.f32.partialorder %v2499_v37, %v2485_v35  ;;  %vm797_vm2 = vcmp.eq.f32.partialorder %v2200_v47, %v2501_v32  ;;  %v2521_v63 = vsel %vm1189_vm12, %v887_v6, %v888_v24  ;;  %v936_v15 = vshra.s32 %v2504_v11, 16  ;;  %v2545_v6 = vld [vmem:[#allocation2 + $0x28] sm:$0xff] }
 0x17f   : > { %3856 = vst [vmem:[#allocation35_spill] sm:$0xff] %v2521_v63  ;;  %v1512_v36 = vsel %vm3735_vm0, %v2499_v37, %v2485_v35  ;;  %vm798_vm5 = vcmp.eq.f32.partialorder %v2204_v49, %v2501_v32  ;;  %vm3761_vm6 = vcmp.gt.f32.partialorder %v2501_v32, %v2493_v18  ;;  %v2532_v38 = vcvt.s32.f32 %v952_v29  ;;  %3858 = vst [vmem:[#allocation37_spill] sm:$0xff] %v2545_v6  ;;  %v2579_v49 = vld [vmem:[#allocation2 + $0xa8] sm:$0xff] }
 0x180   : > { %vm796_vm7 = vcmp.eq.f32.partialorder %v2194_v44, %v2460_v27  ;;  %1545 = vst.msk [vmem:[#allocation2 + $0x98] sm:$0xff] %vm231_vm1, %v1512_v36  ;;  %v1497_v24 = vsel %vm3761_vm6, %v2501_v32, %v2493_v18  ;;  %vm1205_vm12 = vcmp.lt.s32.totalorder %v889_v25, %v890_v46  ;;  %v1192_v35 = vshra.s32 %v2521_v63, 16  ;;  %3863 = vst [vmem:[#allocation42_spill] sm:$0xff] %v2579_v49 }
 0x181   : > { %1530 = vst.msk [vmem:[#allocation2 + $0x20] sm:$0xff] %vm231_vm1, %v1497_v24  ;;  %955 = vmin.xlane.f32.xlu0 %v2532_v38  ;;  %v2549_v30 = vpop.xlane.xlu0 %754  ;;  %v2551_v29 = vpop.xlane.xlu1 %709  ;;  %v2553_v36 = vsel %vm1205_vm12, %v889_v25, %v890_v46  ;;  %v861_v18 = vsel %vm797_vm2, %v2346_v39, 1073741824  ;;  %v862_v24 = vsel %vm798_vm5, %v2351_v0, 1073741824  ;;  %v2564_v12 = vcvt.s32.f32 %v936_v15  ;;  %v2589_v15 = vld [vmem:[#allocation2 + $0x30] sm:$0xff] }
 0x182   : > { %3859 = vst [vmem:[#allocation38_spill] sm:$0xff] %v2549_v30  ;;  %3860 = vst [vmem:[#allocation39_spill] sm:$0xff] %v2551_v29  ;;  %vm829_vm13 = vcmp.eq.f32.partialorder %v2202_v48, %v2549_v30  ;;  %vm830_vm12 = vcmp.eq.f32.partialorder %v2206_v50, %v2549_v30  ;;  %vm3744_vm0 = vcmp.gt.f32.partialorder %v2549_v30, %v2534_v26  ;;  %v1208_v46 = vshra.s32 %v2553_v36, 16 }
 0x183   : > { %3861 = vst [vmem:[#allocation40_spill] sm:$0xff] %v2553_v36  ;;  %3862 = vst [vmem:[#allocation41_spill] sm:$0xff] %v2564_v12  ;;  %v1513_v47 = vsel %vm3744_vm0, %v2549_v30, %v2534_v26  ;;  %vm3743_vm2 = vcmp.gt.f32.partialorder %v2551_v29, %v2545_v6  ;;  %939 = vmin.xlane.f32.xlu1 %v2564_v12  ;;  %vm981_vm5 = vcmp.lt.s32.totalorder %v861_v18, %v862_v24 }
 0x184   : > { %1546 = vst.msk [vmem:[#allocation2 + $0xa0] sm:$0xff] %vm231_vm1, %v1513_v47  ;;  %v1498_v25 = vsel %vm3743_vm2, %v2551_v29, %v2545_v6  ;;  %3864 = vst [vmem:[#allocation43_spill] sm:$0xff] %v2589_v15  ;;  %v859_v26 = vsel %vm795_vm14, %v2346_v39, 1073741824  ;;  %v2600_v12 = vsel %vm981_vm5, %v861_v18, %v862_v24  ;;  %v860_v6 = vsel %vm796_vm7, %v2351_v0, 1073741824  ;;  %v2640_v18 = vld [vmem:[#allocation2 + $0xb0] sm:$0xff] }
 0x185   : > { %1531 = vst.msk [vmem:[#allocation2 + $0x28] sm:$0xff] %vm231_vm1, %v1498_v25  ;;  %v2596_v32 = vpop.xlane.xlu1 %757  ;;  %v2598_v47 = vpop.xlane.xlu0 %712  ;;  %v893_v63 = vsel %vm829_vm13, %v2346_v39, 1073741824  ;;  %v894_v41 = vsel %vm830_vm12, %v2351_v0, 1073741824  ;;  %v2614_v25 = vcvt.s32.f32 %v1208_v46  ;;  %v2616_v36 = vcvt.s32.f32 %v1192_v35  ;;  %3867 = vst [vmem:[#allocation46_spill] sm:$0xff] %v2640_v18  ;;  %v2642_v35 = vld [vmem:[#allocation2 + $0x38] sm:$0xff] }
 0x186   : > { %3865 = vst [vmem:[#allocation44_spill] sm:$0xff] %v2596_v32  ;;  %3866 = vst [vmem:[#allocation45_spill] sm:$0xff] %v2598_v47  ;;  %vm3742_vm14 = vcmp.gt.f32.partialorder %v2596_v32, %v2579_v49  ;;  %vm827_vm7 = vcmp.eq.f32.partialorder %v2190_v42, %v2499_v37  ;;  %vm828_vm5 = vcmp.eq.f32.partialorder %v2196_v45, %v2499_v37  ;;  %v984_v50 = vshra.s32 %v2600_v12, 16 }
 0x187   : > { %v1514_v44 = vsel %vm3742_vm14, %v2596_v32, %v2579_v49  ;;  %vm3749_vm13 = vcmp.gt.f32.partialorder %v2598_v47, %v2589_v15  ;;  %1211 = vmin.xlane.f32.xlu0 %v2614_v25  ;;  %1195 = vmin.xlane.f32.xlu1 %v2616_v36  ;;  %vm965_vm12 = vcmp.lt.s32.totalorder %v859_v26, %v860_v6  ;;  %v891_v27 = vsel %vm827_vm7, %v2346_v39, 1073741824 }
 0x188   : > { %1547 = vst.msk [vmem:[#allocation2 + $0xa8] sm:$0xff] %vm231_vm1, %v1514_v44  ;;  %v1499_v48 = vsel %vm3749_vm13, %v2598_v47, %v2589_v15  ;;  %3868 = vst [vmem:[#allocation47_spill] sm:$0xff] %v2642_v35  ;;  %vm1237_vm14 = vcmp.lt.s32.totalorder %v893_v63, %v894_v41  ;;  %vm801_vm2 = vcmp.eq.f32.partialorder %v2224_v59, %v2598_v47  ;;  %v2657_v15 = vcvt.s32.f32 %v984_v50 }
 0x189   : > { %vm802_vm0 = vcmp.eq.f32.partialorder %v2228_v61, %v2598_v47  ;;  %1532 = vst.msk [vmem:[#allocation2 + $0x30] sm:$0xff] %vm231_vm1, %v1499_v48  ;;  %v2649_v24 = vsel %vm965_vm12, %v859_v26, %v860_v6  ;;  %v2651_v46 = vpop.xlane.xlu0 %760  ;;  %v2653_v44 = vpop.xlane.xlu1 %715  ;;  %v2655_v49 = vsel %vm1237_vm14, %v893_v63, %v894_v41  ;;  %v892_v26 = vsel %vm828_vm5, %v2351_v0, 1073741824  ;;  %v2688_v41 = vld [vmem:[#allocation2 + $0xb8] sm:$0xff]  ;;  %v2696_v48 = vld [vmem:[#allocation2 + $0x40] sm:$0xff] }
 0x18a   : > { %3869 = vst [vmem:[#allocation48_spill] sm:$0xff] %v2651_v46  ;;  %3870 = vst [vmem:[#allocation49_spill] sm:$0xff] %v2653_v44  ;;  %v968_v30 = vshra.s32 %v2649_v24, 16  ;;  %vm799_vm12 = vcmp.eq.f32.partialorder %v2212_v53, %v2551_v29  ;;  %vm3758_vm14 = vcmp.gt.f32.partialorder %v2651_v46, %v2640_v18  ;;  %vm3753_vm13 = vcmp.gt.f32.partialorder %v2653_v44, %v2642_v35 }
 0x18b   : > { %987 = vmin.xlane.f32.xlu0 %v2657_v15  ;;  %v1515_v42 = vsel %vm3758_vm14, %v2651_v46, %v2640_v18  ;;  %v1500_v45 = vsel %vm3753_vm13, %v2653_v44, %v2642_v35  ;;  %v1240_v6 = vshra.s32 %v2655_v49, 16  ;;  %3871 = vst [vmem:[#allocation50_spill] sm:$0xff] %v2688_v41  ;;  %vm800_vm7 = vcmp.eq.f32.partialorder %v2218_v56, %v2551_v29 }
 0x18c   : > { %v2675_v63 = vcvt.s32.f32 %v968_v30  ;;  %1548 = vst.msk [vmem:[#allocation2 + $0xb0] sm:$0xff] %vm231_vm1, %v1515_v42  ;;  %1533 = vst.msk [vmem:[#allocation2 + $0x38] sm:$0xff] %vm231_vm1, %v1500_v45  ;;  %vm1221_vm5 = vcmp.lt.s32.totalorder %v891_v27, %v892_v26  ;;  %v865_v35 = vsel %vm801_vm2, %v2346_v39, 1073741824  ;;  %v866_v18 = vsel %vm802_vm0, %v2351_v0, 1073741824 }
 0x18d   : > { %v2694_v30 = vpop.xlane.xlu1 %763  ;;  %3873 = vst [vmem:[#allocation52_spill] sm:$0xff] %v2696_v48  ;;  %v2698_v50 = vpop.xlane.xlu0 %718  ;;  %v2709_v42 = vcvt.s32.f32 %v1240_v6  ;;  %v2711_v45 = vsel %vm1221_vm5, %v891_v27, %v892_v26  ;;  %v863_v37 = vsel %vm799_vm12, %v2346_v39, 1073741824  ;;  %vm831_vm13 = vcmp.eq.f32.partialorder %v2214_v54, %v2596_v32  ;;  %v2736_v27 = vld [vmem:[#allocation2 + $0xc0] sm:$0xff] }
 0x18e   : > { %3872 = vst [vmem:[#allocation51_spill] sm:$0xff] %v2694_v30  ;;  %3874 = vst [vmem:[#allocation53_spill] sm:$0xff] %v2698_v50  ;;  %971 = vmin.xlane.f32.xlu1 %v2675_v63  ;;  %vm833_vm2 = vcmp.eq.f32.partialorder %v2226_v60, %v2651_v46  ;;  %v1224_v59 = vshra.s32 %v2711_v45, 16  ;;  %vm3755_vm0 = vcmp.gt.f32.partialorder %v2694_v30, %v2688_v41  ;;  %v864_v61 = vsel %vm800_vm7, %v2351_v0, 1073741824 }
 0x18f   : > { %3875 = vst [vmem:[#allocation54_spill] sm:$0xff] %v2709_v42  ;;  %1243 = vmin.xlane.f32.xlu0 %v2709_v42  ;;  %v1516_v53 = vsel %vm3755_vm0, %v2694_v30, %v2688_v41  ;;  %vm3759_vm12 = vcmp.gt.f32.partialorder %v2698_v50, %v2696_v48  ;;  %vm1013_vm5 = vcmp.lt.s32.totalorder %v865_v35, %v866_v18  ;;  %3876 = vst [vmem:[#allocation55_spill] sm:$0xff] %v2736_v27  ;;  %v2750_v42 = vld [vmem:[#allocation2 + $0x48] sm:$0xff] }
 0x190   : > { %v2738_v26 = vcvt.s32.f32 %v1224_v59  ;;  %1549 = vst.msk [vmem:[#allocation2 + $0xb8] sm:$0xff] %vm231_vm1, %v1516_v53  ;;  %v1501_v6 = vsel %vm3759_vm12, %v2698_v50, %v2696_v48  ;;  %v2746_v41 = vsel %vm1013_vm5, %v865_v35, %v866_v18  ;;  %vm997_vm0 = vcmp.lt.s32.totalorder %v863_v37, %v864_v61  ;;  %3878 = vst [vmem:[#allocation57_spill] sm:$0xff] %v2750_v42 }
 0x191   : > { %v2748_v47 = vpop.xlane.xlu0 %766  ;;  %v2752_v56 = vpop.xlane.xlu1 %721  ;;  %vm832_vm7 = vcmp.eq.f32.partialorder %v2220_v57, %v2596_v32  ;;  %vm834_vm14 = vcmp.eq.f32.partialorder %v2230_v62, %v2651_v46  ;;  %1534 = vst.msk [vmem:[#allocation2 + $0x40] sm:$0xff] %vm231_vm1, %v1501_v6  ;;  %v1016_v59 = vshra.s32 %v2746_v41, 16  ;;  %v2760_v53 = vsel %vm997_vm0, %v863_v37, %v864_v61  ;;  %v2785_v6 = vld [vmem:[#allocation2 + $0xc8] sm:$0xff]  ;;  %v2817_v62 = vld [vmem:[#allocation2 + $0x50] sm:$0xff]  ;;  %v2876_v46 = vld [vmem:[#allocation2 + $0x58] sm:$0xff] }
 0x192   : > { %3877 = vst [vmem:[#allocation56_spill] sm:$0xff] %v2748_v47  ;;  %3879 = vst [vmem:[#allocation58_spill] sm:$0xff] %v2752_v56  ;;  %vm803_vm5 = vcmp.eq.f32.partialorder %v2236_v1, %v2653_v44  ;;  %vm804_vm12 = vcmp.eq.f32.partialorder %v2242_v4, %v2653_v44  ;;  %1227 = vmin.xlane.f32.xlu1 %v2738_v26  ;;  %v1000_v18 = vshra.s32 %v2760_v53, 16  ;;  %v897_v61 = vsel %vm833_vm2, %v2346_v39, 1073741824 }
 0x193   : > { %vm3766_vm10 = vcmp.gt.f32.partialorder %v2748_v47, %v2736_v27  ;;  %vm835_vm6 = vcmp.eq.f32.partialorder %v2238_v2, %v2694_v30  ;;  %v2772_v35 = vcvt.s32.f32 %v1016_v59  ;;  %vm3765_vm0 = vcmp.gt.f32.partialorder %v2752_v56, %v2750_v42  ;;  %3880 = vst [vmem:[#allocation59_spill] sm:$0xff] %v2785_v6  ;;  %3883 = vst [vmem:[#allocation62_spill] sm:$0xff] %v2817_v62 }
 0x194   : > { %v1517_v37 = vsel %vm3766_vm10, %v2748_v47, %v2736_v27  ;;  %v2787_v48 = vcvt.s32.f32 %v1000_v18  ;;  %v1502_v59 = vsel %vm3765_vm0, %v2752_v56, %v2750_v42  ;;  %v898_v27 = vsel %vm834_vm14, %v2351_v0, 1073741824  ;;  %3887 = vst [vmem:[#allocation66_spill] sm:$0xff] %v2876_v46 }
 0x195   : > { %1550 = vst.msk [vmem:[#allocation2 + $0xc0] sm:$0xff] %vm231_vm1, %v1517_v37  ;;  %v895_v60 = vsel %vm831_vm13, %v2346_v39, 1073741824  ;;  %v2803_v18 = vpop.xlane.xlu1 %769  ;;  %v2805_v29 = vpop.xlane.xlu0 %724  ;;  %vm805_vm2 = vcmp.eq.f32.partialorder %v2248_v7, %v2698_v50  ;;  %vm806_vm0 = vcmp.eq.f32.partialorder %v2252_v9, %v2698_v50  ;;  %1019 = vmin.xlane.f32.xlu0 %v2772_v35  ;;  %1535 = vst.msk [vmem:[#allocation2 + $0x48] sm:$0xff] %vm231_vm1, %v1502_v59  ;;  %v896_v54 = vsel %vm832_vm7, %v2351_v0, 1073741824 }
 0x196   : > { %3881 = vst [vmem:[#allocation60_spill] sm:$0xff] %v2803_v18  ;;  %3882 = vst [vmem:[#allocation61_spill] sm:$0xff] %v2805_v29  ;;  %vm1269_vm14 = vcmp.lt.s32.totalorder %v897_v61, %v898_v27  ;;  %vm836_vm13 = vcmp.eq.f32.partialorder %v2244_v5, %v2694_v30  ;;  %1003 = vmin.xlane.f32.xlu1 %v2787_v48  ;;  %vm1253_vm10 = vcmp.lt.s32.totalorder %v895_v60, %v896_v54 }
 0x197   : > { %v2822_v37 = vsel %vm1269_vm14, %v897_v61, %v898_v27  ;;  %vm3775_vm8 = vcmp.gt.f32.partialorder %v2803_v18, %v2785_v6  ;;  %vm837_vm9 = vcmp.eq.f32.partialorder %v2250_v8, %v2748_v47  ;;  %v2829_v57 = vsel %vm1253_vm10, %v895_v60, %v896_v54  ;;  %v2848_v54 = vld [vmem:[#allocation2 + $0xd0] sm:$0xff] }
 0x198   : > { %v1272_v59 = vshra.s32 %v2822_v37, 16  ;;  %v1518_v42 = vsel %vm3775_vm8, %v2803_v18, %v2785_v6  ;;  %v1256_v27 = vshra.s32 %v2829_v57, 16  ;;  %vm3788_vm7 = vcmp.gt.f32.partialorder %v2805_v29, %v2817_v62  ;;  %3884 = vst [vmem:[#allocation63_spill] sm:$0xff] %v2848_v54 }
 0x199   : > { %1551 = vst.msk [vmem:[#allocation2 + $0xc8] sm:$0xff] %vm231_vm1, %v1518_v42  ;;  %v869_v61 = vsel %vm805_vm2, %v2346_v39, 1073741824  ;;  %v870_v60 = vsel %vm806_vm0, %v2351_v0, 1073741824  ;;  %v2850_v6 = vpop.xlane.xlu0 %772  ;;  %v2852_v32 = vpop.xlane.xlu1 %727  ;;  %v1503_v7 = vsel %vm3788_vm7, %v2805_v29, %v2817_v62  ;;  %v867_v9 = vsel %vm803_vm5, %v2346_v39, 1073741824 }
 0x19a   : > { %3885 = vst [vmem:[#allocation64_spill] sm:$0xff] %v2850_v6  ;;  %3886 = vst [vmem:[#allocation65_spill] sm:$0xff] %v2852_v32  ;;  %v2854_v42 = vcvt.s32.f32 %v1272_v59  ;;  %vm1045_vm10 = vcmp.lt.s32.totalorder %v869_v61, %v870_v60  ;;  %vm838_vm0 = vcmp.eq.f32.partialorder %v2254_v10, %v2748_v47  ;;  %v2867_v50 = vcvt.s32.f32 %v1256_v27  ;;  %v2937_v10 = vld [vmem:[#allocation2 + $0x60] sm:$0xff] }
 0x19b   : > { %1536 = vst.msk [vmem:[#allocation2 + $0x50] sm:$0xff] %vm231_vm1, %v1503_v7  ;;  %v2870_v59 = vsel %vm1045_vm10, %v869_v61, %v870_v60  ;;  %v868_v62 = vsel %vm804_vm12, %v2351_v0, 1073741824  ;;  %vm807_vm2 = vcmp.eq.f32.partialorder %v2260_v13, %v2752_v56  ;;  %vm3781_vm14 = vcmp.gt.f32.partialorder %v2850_v6, %v2848_v54  ;;  %3891 = vst [vmem:[#allocation70_spill] sm:$0xff] %v2937_v10 }
 0x19c   : > { %1275 = vmin.xlane.f32.xlu0 %v2854_v42  ;;  %v1048_v1 = vshra.s32 %v2870_v59, 16  ;;  %vm1029_vm5 = vcmp.lt.s32.totalorder %v867_v9, %v868_v62  ;;  %vm808_vm10 = vcmp.eq.f32.partialorder %v2266_v16, %v2752_v56  ;;  %1259 = vmin.xlane.f32.xlu1 %v2867_v50  ;;  %vm809_vm12 = vcmp.eq.f32.partialorder %v2272_v19, %v2805_v29 }
 0x19d   : > { %v2889_v4 = vsel %vm1029_vm5, %v867_v9, %v868_v62  ;;  %v1519_v27 = vsel %vm3781_vm14, %v2850_v6, %v2848_v54  ;;  %v2896_v61 = vpop.xlane.xlu1 %775  ;;  %v2898_v60 = vpop.xlane.xlu0 %730  ;;  %vm839_vm8 = vcmp.eq.f32.partialorder %v2262_v14, %v2803_v18  ;;  %vm3779_vm5 = vcmp.gt.f32.partialorder %v2852_v32, %v2876_v46  ;;  %v2912_v9 = vld [vmem:[#allocation2 + $0xd8] sm:$0xff]  ;;  %v3904_v14 = vld [vmem:[#allocation5_spill] sm:$0xff] }
 0x19e   : > { %3888 = vst [vmem:[#allocation67_spill] sm:$0xff] %v2898_v60  ;;  %v2902_v7 = vcvt.s32.f32 %v1048_v1  ;;  %v1032_v44 = vshra.s32 %v2889_v4, 16  ;;  %1552 = vst.msk [vmem:[#allocation2 + $0xd0] sm:$0xff] %vm231_vm1, %v1519_v27  ;;  %v901_v62 = vsel %vm837_vm9, %v2346_v39, 1073741824  ;;  %v1504_v1 = vsel %vm3779_vm5, %v2852_v32, %v2876_v46 }
 0x19f   : > { %3889 = vst [vmem:[#allocation68_spill] sm:$0xff] %v2912_v9  ;;  %v902_v27 = vsel %vm838_vm0, %v2351_v0, 1073741824  ;;  %v899_v54 = vsel %vm835_vm6, %v2346_v39, 1073741824  ;;  %v900_v8 = vsel %vm836_vm13, %v2351_v0, 1073741824  ;;  %vm810_vm9 = vcmp.eq.f32.partialorder %v2276_v21, %v2805_v29  ;;  %1537 = vst.msk [vmem:[#allocation2 + $0x58] sm:$0xff] %vm231_vm1, %v1504_v1 }
 0x1a0   : > { %1051 = vmin.xlane.f32.xlu0 %v2902_v7  ;;  %v2934_v46 = vcvt.s32.f32 %v1032_v44  ;;  %vm1301_vm0 = vcmp.lt.s32.totalorder %v901_v62, %v902_v27  ;;  %vm1285_vm5 = vcmp.lt.s32.totalorder %v899_v54, %v900_v8  ;;  %vm840_vm6 = vcmp.eq.f32.partialorder %v2268_v17, %v2803_v18  ;;  %v3909_v18 = vld [vmem:[#allocation8_spill] sm:$0xff] }
 0x1a1   : > { %v2941_v2 = vsel %vm1301_vm0, %v901_v62, %v902_v27  ;;  %v2943_v5 = vsel %vm1285_vm5, %v899_v54, %v900_v8  ;;  %vm3785_vm13 = vcmp.gt.f32.partialorder %v2896_v61, %v2912_v9  ;;  %v2947_v30 = vpop.xlane.xlu0 %778  ;;  %v2949_v44 = vpop.xlane.xlu1 %733  ;;  %vm841_vm14 = vcmp.eq.f32.partialorder %v2274_v20, %v2850_v6  ;;  %v2974_v8 = vld [vmem:[#allocation2 + $0xe0] sm:$0xff] }
 0x1a2   : > { %3890 = vst [vmem:[#allocation69_spill] sm:$0xff] %v2934_v46  ;;  %3892 = vst [vmem:[#allocation71_spill] sm:$0xff] %v2947_v30  ;;  %1035 = vmin.xlane.f32.xlu1 %v2934_v46  ;;  %v1304_v1 = vshra.s32 %v2941_v2, 16  ;;  %v1288_v47 = vshra.s32 %v2943_v5, 16  ;;  %v1520_v54 = vsel %vm3785_vm13, %v2896_v61, %v2912_v9  ;;  %vm842_vm5 = vcmp.eq.f32.partialorder %v2278_v22, %v2850_v6  ;;  %v3061_v22 = vld [vmem:[#allocation2 + $0x70] sm:$0xff] }
 0x1a3   : > { %3893 = vst [vmem:[#allocation72_spill] sm:$0xff] %v2949_v44  ;;  %1553 = vst.msk [vmem:[#allocation2 + $0xd8] sm:$0xff] %vm231_vm1, %v1520_v54  ;;  %vm3787_vm0 = vcmp.gt.f32.partialorder %v2898_v60, %v2937_v10  ;;  %v873_v62 = vsel %vm809_vm12, %v2346_v39, 1073741824  ;;  %v874_v27 = vsel %vm810_vm9, %v2351_v0, 1073741824  ;;  %vm811_vm12 = vcmp.eq.f32.partialorder %v2284_v33, %v2852_v32  ;;  %v3917_v33 = vld [vmem:[#allocation11_spill] sm:$0xff] }
 0x1a4   : > { %3894 = vst [vmem:[#allocation73_spill] sm:$0xff] %v2974_v8  ;;  %v2976_v9 = vcvt.s32.f32 %v1304_v1  ;;  %v2978_v46 = vcvt.s32.f32 %v1288_v47  ;;  %v1505_v54 = vsel %vm3787_vm0, %v2898_v60, %v2937_v10  ;;  %vm1077_vm13 = vcmp.lt.s32.totalorder %v873_v62, %v874_v27  ;;  %v2998_v1 = vld [vmem:[#allocation2 + $0x68] sm:$0xff] }
 0x1a5   : > { %1538 = vst.msk [vmem:[#allocation2 + $0x60] sm:$0xff] %vm231_vm1, %v1505_v54  ;;  %v2988_v19 = vsel %vm1077_vm13, %v873_v62, %v874_v27  ;;  %v871_v21 = vsel %vm807_vm2, %v2346_v39, 1073741824  ;;  %v872_v47 = vsel %vm808_vm10, %v2351_v0, 1073741824  ;;  %3896 = vst [vmem:[#allocation75_spill] sm:$0xff] %v2998_v1  ;;  %v3000_v10 = vpop.xlane.xlu1 %781  ;;  %vm812_vm9 = vcmp.eq.f32.partialorder %v2290_v40, %v2852_v32  ;;  %v3009_v13 = vpop.xlane.xlu0 %736 }
 0x1a6   : > { %3895 = vst [vmem:[#allocation74_spill] sm:$0xff] %v2978_v46  ;;  %3897 = vst [vmem:[#allocation76_spill] sm:$0xff] %v3000_v10  ;;  %1307 = vmin.xlane.f32.xlu0 %v2976_v9  ;;  %1291 = vmin.xlane.f32.xlu1 %v2978_v46  ;;  %v1080_v62 = vshra.s32 %v2988_v19, 16  ;;  %vm1061_vm13 = vcmp.lt.s32.totalorder %v871_v21, %v872_v47  ;;  %vm3796_vm2 = vcmp.gt.f32.partialorder %v2947_v30, %v2974_v8  ;;  %v3915_v46 = vld [vmem:[#allocation9_spill] sm:$0xff] }
 0x1a7   : > { %vm813_vm10 = vcmp.eq.f32.partialorder %v2296_v51, %v2898_v60  ;;  %vm814_vm0 = vcmp.eq.f32.partialorder %v2300_v55, %v2898_v60  ;;  %v3015_v16 = vsel %vm1061_vm13, %v871_v21, %v872_v47  ;;  %v1521_v27 = vsel %vm3796_vm2, %v2947_v30, %v2974_v8  ;;  %v3036_v47 = vld [vmem:[#allocation2 + $0xe8] sm:$0xff] }
 0x1a8   : > { %3898 = vst [vmem:[#allocation77_spill] sm:$0xff] %v3015_v16  ;;  %vm843_vm7 = vcmp.eq.f32.partialorder %v2286_v34, %v2896_v61  ;;  %vm844_vm15 = vcmp.eq.f32.partialorder %v2292_v43, %v2896_v61  ;;  %v3026_v54 = vcvt.s32.f32 %v1080_v62  ;;  %v1064_v56 = vshra.s32 %v3015_v16, 16  ;;  %1554 = vst.msk [vmem:[#allocation2 + $0xe0] sm:$0xff] %vm231_vm1, %v1521_v27  ;;  %v3914_v16 = vld [vmem:[#allocation7_spill] sm:$0xff] }
 0x1a9   : > { %vm3794_vm13 = vcmp.gt.f32.partialorder %v2949_v44, %v2998_v1  ;;  %v905_v21 = vsel %vm841_vm14, %v2346_v39, 1073741824  ;;  %3900 = vst [vmem:[#allocation79_spill] sm:$0xff] %v3036_v47  ;;  %v906_v27 = vsel %vm842_vm5, %v2351_v0, 1073741824  ;;  %v903_v8 = vsel %vm839_vm8, %v2346_v39, 1073741824 }
 0x1aa   : > { %3899 = vst [vmem:[#allocation78_spill] sm:$0xff] %v3026_v54  ;;  %v1506_v62 = vsel %vm3794_vm13, %v2949_v44, %v2998_v1  ;;  %v904_v20 = vsel %vm840_vm6, %v2351_v0, 1073741824  ;;  %1083 = vmin.xlane.f32.xlu0 %v3026_v54  ;;  %v3056_v29 = vcvt.s32.f32 %v1064_v56  ;;  %v3902_v1 = vld [vmem:[#allocation4_spill] sm:$0xff]  ;;  %vm1333_vm5 = vcmp.lt.s32.totalorder %v905_v21, %v906_v27  ;;  %v3071_v56 = vpop.xlane.xlu1 %739 }
 0x1ab   : > { %vm845_vm14 = vcmp.eq.f32.partialorder %v3902_v1, %v2947_v30  ;;  %1539 = vst.msk [vmem:[#allocation2 + $0x68] sm:$0xff] %vm231_vm1, %v1506_v62  ;;  %vm1317_vm13 = vcmp.lt.s32.totalorder %v903_v8, %v904_v20  ;;  %3903 = vst [vmem:[#allocation4_spill] sm:$0xff] %v3061_v22  ;;  %vm846_vm8 = vcmp.eq.f32.partialorder %v3904_v14, %v2947_v30  ;;  %v3908_v62 = vld [vmem:[#allocation6_spill] sm:$0xff]  ;;  %v908_v1 = vsel %vm844_vm15, %v2351_v0, 1073741824  ;;  %v3922_v14 = vld [vmem:[#allocation12_spill] sm:$0xff] }
 0x1ac   : > { %3901 = vst [vmem:[#allocation80_spill] sm:$0xff] %v3056_v29  ;;  %v3065_v6 = vsel %vm1333_vm5, %v905_v21, %v906_v27  ;;  %v3067_v17 = vsel %vm1317_vm13, %v903_v8, %v904_v20  ;;  %vm3806_vm6 = vcmp.gt.f32.partialorder %v3000_v10, %v3036_v47  ;;  %3907 = vst [vmem:[#allocation82_spill] sm:$0xff] %v3071_v56  ;;  %1067 = vmin.xlane.f32.xlu1 %v3056_v29  ;;  %v3087_v27 = vpop.xlane.xlu0 %784  ;;  %v3911_v20 = vld [vmem:[#allocation10_spill] sm:$0xff] }
 0x1ad   : > { %3905 = vst [vmem:[#allocation5_spill] sm:$0xff] %v3065_v6  ;;  %3906 = vst [vmem:[#allocation81_spill] sm:$0xff] %v3067_v17  ;;  %vm815_vm2 = vcmp.eq.f32.partialorder %v3908_v62, %v2949_v44  ;;  %vm816_vm3 = vcmp.eq.f32.partialorder %v3909_v18, %v2949_v44  ;;  %v1336_v54 = vshra.s32 %v3065_v6, 16  ;;  %v1320_v21 = vshra.s32 %v3067_v17, 16  ;;  %v3102_v17 = vld [vmem:[#allocation2 + $0xf0] sm:$0xff] }
 0x1ae   : > { %v1522_v8 = vsel %vm3806_vm6, %v3000_v10, %v3036_v47  ;;  %vm817_vm13 = vcmp.eq.f32.partialorder %v2320_v23, %v3009_v13  ;;  %3910 = vst [vmem:[#allocation6_spill] sm:$0xff] %v3087_v27  ;;  %vm818_vm5 = vcmp.eq.f32.partialorder %v3911_v20, %v3009_v13  ;;  %vm3810_vm11 = vcmp.gt.f32.partialorder %v3009_v13, %v3061_v22  ;;  %v3150_v32 = vpop.xlane.xlu1 %787  ;;  %v3923_v30 = vld [vmem:[#allocation14_spill] sm:$0xff] }
 0x1af   : > { %1555 = vst.msk [vmem:[#allocation2 + $0xe8] sm:$0xff] %vm231_vm1, %v1522_v8  ;;  %v877_v29 = vsel %vm813_vm10, %v2346_v39, 1073741824  ;;  %v878_v47 = vsel %vm814_vm0, %v2351_v0, 1073741824  ;;  %3912 = vst [vmem:[#allocation8_spill] sm:$0xff] %v3102_v17  ;;  %v3104_v6 = vcvt.s32.f32 %v1336_v54  ;;  %v3106_v8 = vcvt.s32.f32 %v1320_v21 }
 0x1b0   : > { %vm847_vm6 = vcmp.eq.f32.partialorder %v3914_v16, %v3000_v10  ;;  %v1507_v51 = vsel %vm3810_vm11, %v3009_v13, %v3061_v22  ;;  %vm1109_vm10 = vcmp.lt.s32.totalorder %v877_v29, %v878_v47  ;;  %v875_v54 = vsel %vm811_vm12, %v2346_v39, 1073741824  ;;  %v3130_v22 = vld [vmem:[#allocation2 + $0x78] sm:$0xff]  ;;  %3920 = vst [vmem:[#allocation11_spill] sm:$0xff] %v3150_v32 }
 0x1b1   : > { %3913 = vst [vmem:[#allocation10_spill] sm:$0xff] %v3106_v8  ;;  %1540 = vst.msk [vmem:[#allocation2 + $0x70] sm:$0xff] %vm231_vm1, %v1507_v51  ;;  %v3118_v55 = vsel %vm1109_vm10, %v877_v29, %v878_v47  ;;  %v876_v21 = vsel %vm812_vm9, %v2351_v0, 1073741824  ;;  %vm849_vm0 = vcmp.eq.f32.partialorder %v2322_v28, %v3087_v27  ;;  %1339 = vmin.xlane.f32.xlu0 %v3104_v6  ;;  %1323 = vmin.xlane.f32.xlu1 %v3106_v8  ;;  %v3919_v51 = vld [vmem:[#allocation13_spill] sm:$0xff] }
 0x1b2   : > { %3916 = vst [vmem:[#allocation7_spill] sm:$0xff] %v3130_v22  ;;  %v1112_v29 = vshra.s32 %v3118_v55, 16  ;;  %vm1093_vm10 = vcmp.lt.s32.totalorder %v875_v54, %v876_v21  ;;  %vm850_vm12 = vcmp.eq.f32.partialorder %v3917_v33, %v3087_v27  ;;  %vm1491_vm11 = vcmp.gt.f32.partialorder %v3087_v27, %v3102_v17 }
 0x1b3   : > { %v3139_v40 = vsel %vm1093_vm10, %v875_v54, %v876_v21  ;;  %v1523_v47 = vsel %vm1491_vm11, %v3087_v27, %v3102_v17  ;;  %vm819_vm9 = vcmp.eq.f32.partialorder %v2332_v58, %v3071_v56  ;;  %vm820_vm4 = vcmp.eq.f32.partialorder %v3919_v51, %v3071_v56  ;;  %v3162_v21 = vld [vmem:[#allocation2 + $0xf8] sm:$0xff] }
 0x1b4   : > { %3918 = vst [vmem:[#allocation9_spill] sm:$0xff] %v3139_v40  ;;  %v3152_v60 = vcvt.s32.f32 %v1112_v29  ;;  %v1096_v8 = vshra.s32 %v3139_v40, 16  ;;  %1556 = vst.msk [vmem:[#allocation2 + $0xf0] sm:$0xff] %vm231_vm1, %v1523_v47  ;;  %vm3816_vm10 = vcmp.gt.f32.partialorder %v3071_v56, %v3130_v22  ;;  %v909_v54 = vsel %vm845_vm14, %v2346_v39, 1073741824 }
 0x1b5   : > { %3921 = vst [vmem:[#allocation13_spill] sm:$0xff] %v3162_v21  ;;  %v1508_v29 = vsel %vm3816_vm10, %v3071_v56, %v3130_v22  ;;  %v910_v47 = vsel %vm846_vm8, %v2351_v0, 1073741824  ;;  %v907_v17 = vsel %vm843_vm7, %v2346_v39, 1073741824  ;;  %vm851_vm8 = vcmp.eq.f32.partialorder %v3922_v14, %v3150_v32 }
 0x1b6   : > { %1115 = vmin.xlane.f32.xlu0 %v3152_v60  ;;  %v3182_v40 = vcvt.s32.f32 %v1096_v8  ;;  %1541 = vst.msk [vmem:[#allocation2 + $0x78] sm:$0xff] %vm231_vm1, %v1508_v29  ;;  %vm1365_vm14 = vcmp.lt.s32.totalorder %v909_v54, %v910_v47  ;;  %vm1349_vm10 = vcmp.lt.s32.totalorder %v907_v17, %v908_v1  ;;  %vm852_vm7 = vcmp.eq.f32.partialorder %v3923_v30, %v3150_v32 }
 0x1b7   : > { %v3187_v22 = vsel %vm1365_vm14, %v909_v54, %v910_v47  ;;  %v3189_v34 = vsel %vm1349_vm10, %v907_v17, %v908_v1  ;;  %vm1492_vm15 = vcmp.gt.f32.partialorder %v3150_v32, %v3162_v21  ;;  %v881_v17 = vsel %vm817_vm13, %v2346_v39, 1073741824 }
 0x1b8   : > { %1099 = vmin.xlane.f32.xlu1 %v3182_v40  ;;  %v1368_v43 = vshra.s32 %v3187_v22, 16  ;;  %v1352_v8 = vshra.s32 %v3189_v34, 16  ;;  %v1524_v54 = vsel %vm1492_vm15, %v3150_v32, %v3162_v21  ;;  %v882_v29 = vsel %vm818_vm5, %v2351_v0, 1073741824 }
 0x1b9   : > { %1557 = vst.msk [vmem:[#allocation2 + $0xf8] sm:$0xff] %vm231_vm1, %v1524_v54  ;;  %v879_v47 = vsel %vm815_vm2, %v2346_v39, 1073741824  ;;  %v880_v1 = vsel %vm816_vm3, %v2351_v0, 1073741824  ;;  %v913_v23 = vsel %vm849_vm0, %v2346_v39, 1073741824  ;;  %vm1141_vm13 = vcmp.lt.s32.totalorder %v881_v17, %v882_v29 }
 0x1ba   : > { %v3224_v54 = vcvt.s32.f32 %v1368_v43  ;;  %v3226_v21 = vcvt.s32.f32 %v1352_v8  ;;  %vm1125_vm5 = vcmp.lt.s32.totalorder %v879_v47, %v880_v1  ;;  %v3228_v20 = vsel %vm1141_vm13, %v881_v17, %v882_v29 }
 0x1bb   : > { %v3230_v62 = vsel %vm1125_vm5, %v879_v47, %v880_v1  ;;  %v914_v18 = vsel %vm850_vm12, %v2351_v0, 1073741824  ;;  %v911_v28 = vsel %vm847_vm6, %v2346_v39, 1073741824  ;;  %v1144_v43 = vshra.s32 %v3228_v20, 16 }
 0x1bc   : > { %1371 = vmin.xlane.f32.xlu0 %v3224_v54  ;;  %1355 = vmin.xlane.f32.xlu1 %v3226_v21  ;;  %v1128_v8 = vshra.s32 %v3230_v62, 16  ;;  %vm1397_vm3 = vcmp.lt.s32.totalorder %v913_v23, %v914_v18  ;;  %vm3924_vm2 = vcmp.eq.f32.partialorder %v3915_v46, %v3000_v10  ;;  %v883_v16 = vsel %vm819_vm9, %v2346_v39, 1073741824 }
 0x1bd   : > { %v912_v33 = vsel %vm3924_vm2, %v2351_v0, 1073741824  ;;  %v3248_v17 = vsel %vm1397_vm3, %v913_v23, %v914_v18  ;;  %v884_v29 = vsel %vm820_vm4, %v2351_v0, 1073741824  ;;  %v3258_v47 = vcvt.s32.f32 %v1144_v43 }
 0x1be   : > { %vm1381_vm0 = vcmp.lt.s32.totalorder %v911_v28, %v912_v33  ;;  %v3260_v1 = vcvt.s32.f32 %v1128_v8  ;;  %v1400_v46 = vshra.s32 %v3248_v17, 16  ;;  %vm1157_vm6 = vcmp.lt.s32.totalorder %v883_v16, %v884_v29 }
 0x1bf   : > { %v3263_v10 = vsel %vm1381_vm0, %v911_v28, %v912_v33  ;;  %v915_v58 = vsel %vm851_vm8, %v2346_v39, 1073741824  ;;  %v916_v51 = vsel %vm852_vm7, %v2351_v0, 1073741824  ;;  %v3278_v28 = vsel %vm1157_vm6, %v883_v16, %v884_v29  ;;  %v3925_v33 = vld [vmem:[#allocation21_spill] sm:$0xff] }
 0x1c0   : > { %v1384_v23 = vshra.s32 %v3263_v10, 16  ;;  %1147 = vmin.xlane.f32.xlu0 %v3258_v47  ;;  %1131 = vmin.xlane.f32.xlu1 %v3260_v1  ;;  %v3276_v18 = vcvt.s32.f32 %v1400_v46  ;;  %vm1413_vm4 = vcmp.lt.s32.totalorder %v915_v58, %v916_v51  ;;  %v1160_v8 = vshra.s32 %v3278_v28, 16 }
 0x1c1   : > { %v3283_v14 = vsel %vm1413_vm4, %v915_v58, %v916_v51  ;;  %v919_v16 = vand.u32 65535, %v3925_v33  ;;  %v3926_v58 = vld [vmem:[#allocation27_spill] sm:$0xff]  ;;  %v935_v33 = vand.u32 65535, %v2504_v11 }
 0x1c2   : > { %v3280_v43 = vcvt.s32.f32 %v1384_v23  ;;  %v3287_v39 = vcvt.s32.f32 %v1160_v8  ;;  %v1416_v0 = vshra.s32 %v3283_v14, 16  ;;  %v1175_v51 = vand.u32 65535, %v3926_v58  ;;  %v3927_v58 = vld [vmem:[#allocation40_spill] sm:$0xff] }
 0x1c3   : > { %v921_v46 = vcvt.s32.f32 %v919_v16 }
 0x1c4   : > { %1403 = vmin.xlane.f32.xlu0 %v3276_v18  ;;  %1387 = vmin.xlane.f32.xlu1 %v3280_v43  ;;  %v3291_v30 = vcvt.s32.f32 %v1416_v0  ;;  %v1177_v32 = vcvt.s32.f32 %v1175_v51  ;;  %v951_v0 = vand.u32 65535, %v2495_v3  ;;  %v1207_v3 = vand.u32 65535, %v3927_v58  ;;  %v3928_v51 = vld [vmem:[#allocation35_spill] sm:$0xff] }
 0x1c5   : > { %v1191_v44 = vand.u32 65535, %v3928_v51  ;;  %v967_v58 = vand.u32 65535, %v2649_v24 }
 0x1c6   : > { %v953_v27 = vcvt.s32.f32 %v951_v0  ;;  %v1209_v0 = vcvt.s32.f32 %v1207_v3  ;;  %v1239_v3 = vand.u32 65535, %v2655_v49  ;;  %v3930_v49 = vld [vmem:[#allocation54_spill] sm:$0xff] }
 0x1c8   : > { %1163 = vmin.xlane.f32.xlu1 %v3287_v39 }
 0x1cc   : > { %1419 = vmin.xlane.f32.xlu1 %v3291_v30 }
 0x1ff   : > { %v3295_v29 = vpop.xlane.xlu0 %923 }
 0x200   : > { %vm925_vm12 = vcmp.eq.f32.partialorder %v2414_v52, %v3295_v29 }
 0x201   : > { %v926_v23 = vsel %vm925_vm12, %v921_v46, inf }
 0x202   : > { %927 = vmin.xlane.f32.xlu0 %v926_v23  ;;  %v937_v23 = vcvt.s32.f32 %v935_v33 }
 0x206   : > { %v3300_v8 = vpop.xlane.xlu0 %1179 }
 0x207   : > { %vm1181_vm9 = vcmp.eq.f32.partialorder %v2483_v31, %v3300_v8 }
 0x208   : > { %v1182_v56 = vsel %vm1181_vm9, %v1177_v32, inf  ;;  %v3929_v32 = vld [vmem:[#allocation41_spill] sm:$0xff] }
 0x209   : > { %1183 = vmin.xlane.f32.xlu0 %v1182_v56 }
 0x20a   : > { %v3306_v16 = vpop.xlane.xlu0 %955 }
 0x20b   : > { %vm957_vm10 = vcmp.eq.f32.partialorder %v2532_v38, %v3306_v16  ;;  %v1193_v38 = vcvt.s32.f32 %v1191_v44  ;;  %v969_v44 = vcvt.s32.f32 %v967_v58 }
 0x20c   : > { %v958_v52 = vsel %vm957_vm10, %v953_v27, inf  ;;  %v3310_v46 = vpop.xlane.xlu1 %939  ;;  %v983_v27 = vand.u32 65535, %v2600_v12 }
 0x20d   : > { %959 = vmin.xlane.f32.xlu0 %v958_v52  ;;  %vm941_vm14 = vcmp.eq.f32.partialorder %v3929_v32, %v3310_v46 }
 0x20e   : > { %v942_v31 = vsel %vm941_vm14, %v937_v23, inf  ;;  %v985_v51 = vcvt.s32.f32 %v983_v27 }
 0x20f   : > { %943 = vmin.xlane.f32.xlu1 %v942_v31  ;;  %v1241_v31 = vcvt.s32.f32 %v1239_v3 }
 0x210   : > { %v3316_v11 = vpop.xlane.xlu0 %1211  ;;  %v3318_v56 = vpop.xlane.xlu1 %1195 }
 0x211   : > { %vm1213_vm8 = vcmp.eq.f32.partialorder %v2614_v25, %v3316_v11  ;;  %vm1197_vm7 = vcmp.eq.f32.partialorder %v2616_v36, %v3318_v56  ;;  %v1223_v36 = vand.u32 65535, %v2711_v45 }
 0x212   : > { %v1214_v33 = vsel %vm1213_vm8, %v1209_v0, inf  ;;  %v1198_v52 = vsel %vm1197_vm7, %v1193_v38, inf }
 0x213   : > { %1215 = vmin.xlane.f32.xlu0 %v1214_v33  ;;  %1199 = vmin.xlane.f32.xlu1 %v1198_v52  ;;  %v1225_v27 = vcvt.s32.f32 %v1223_v36  ;;  %v999_v33 = vand.u32 65535, %v2760_v53  ;;  %v1271_v53 = vand.u32 65535, %v2822_v37  ;;  %v1047_v36 = vand.u32 65535, %v2870_v59 }
 0x214   : > { %v3326_v23 = vpop.xlane.xlu0 %987 }
 0x215   : > { %vm989_vm13 = vcmp.eq.f32.partialorder %v2657_v15, %v3326_v23  ;;  %v1015_v15 = vand.u32 65535, %v2746_v41  ;;  %v1001_v41 = vcvt.s32.f32 %v999_v33 }
 0x216   : > { %v990_v25 = vsel %vm989_vm13, %v985_v51, inf }
 0x217   : > { %v3331_v12 = vpop.xlane.xlu1 %971  ;;  %991 = vmin.xlane.f32.xlu0 %v990_v25  ;;  %v1017_v52 = vcvt.s32.f32 %v1015_v15  ;;  %v1303_v15 = vand.u32 65535, %v2941_v2  ;;  %v3932_v2 = vld [vmem:[#allocation74_spill] sm:$0xff] }
 0x218   : > { %vm973_vm5 = vcmp.eq.f32.partialorder %v2675_v63, %v3331_v12  ;;  %v3336_v32 = vpop.xlane.xlu0 %1243 }
 0x219   : > { %v974_v24 = vsel %vm973_vm5, %v969_v44, inf  ;;  %vm1245_vm3 = vcmp.eq.f32.partialorder %v3930_v49, %v3336_v32  ;;  %v1273_v44 = vcvt.s32.f32 %v1271_v53  ;;  %v1049_v49 = vcvt.s32.f32 %v1047_v36  ;;  %v3933_v53 = vld [vmem:[#allocation77_spill] sm:$0xff]  ;;  %v3934_v36 = vld [vmem:[#allocation78_spill] sm:$0xff] }
 0x21a   : > { %975 = vmin.xlane.f32.xlu1 %v974_v24  ;;  %v1246_v0 = vsel %vm1245_vm3, %v1241_v31, inf }
 0x21b   : > { %v3341_v38 = vpop.xlane.xlu1 %1227  ;;  %1247 = vmin.xlane.f32.xlu0 %v1246_v0 }
 0x21c   : > { %vm1229_vm2 = vcmp.eq.f32.partialorder %v2738_v26, %v3341_v38  ;;  %v1255_v26 = vand.u32 65535, %v2829_v57 }
 0x21d   : > { %v1230_v63 = vsel %vm1229_vm2, %v1225_v27, inf  ;;  %v1287_v27 = vand.u32 65535, %v2943_v5 }
 0x21e   : > { %1231 = vmin.xlane.f32.xlu1 %v1230_v63  ;;  %v3346_v45 = vpop.xlane.xlu0 %1019 }
 0x21f   : > { %v3348_v58 = vpop.xlane.xlu1 %1003  ;;  %vm1021_vm0 = vcmp.eq.f32.partialorder %v2772_v35, %v3346_v45  ;;  %v1257_v35 = vcvt.s32.f32 %v1255_v26 }
 0x220   : > { %v1022_v51 = vsel %vm1021_vm0, %v1017_v52, inf  ;;  %vm1005_vm6 = vcmp.eq.f32.partialorder %v2787_v48, %v3348_v58  ;;  %v1031_v48 = vand.u32 65535, %v2889_v4  ;;  %v1305_v52 = vcvt.s32.f32 %v1303_v15 }
 0x221   : > { %1023 = vmin.xlane.f32.xlu0 %v1022_v51  ;;  %v1006_v3 = vsel %vm1005_vm6, %v1001_v41, inf  ;;  %v1079_v41 = vand.u32 65535, %v2988_v19 }
 0x222   : > { %1007 = vmin.xlane.f32.xlu1 %v1006_v3  ;;  %v1063_v3 = vand.u32 65535, %v3933_v53 }
 0x225   : > { %v3356_v25 = vpop.xlane.xlu0 %1275  ;;  %v3359_v24 = vpop.xlane.xlu1 %1259 }
 0x226   : > { %vm1277_vm4 = vcmp.eq.f32.partialorder %v2854_v42, %v3356_v25  ;;  %vm1261_vm12 = vcmp.eq.f32.partialorder %v2867_v50, %v3359_v24  ;;  %v1033_v42 = vcvt.s32.f32 %v1031_v48  ;;  %v3931_v50 = vld [vmem:[#allocation69_spill] sm:$0xff] }
 0x227   : > { %v1278_v31 = vsel %vm1277_vm4, %v1273_v44, inf  ;;  %v1262_v37 = vsel %vm1261_vm12, %v1257_v35, inf  ;;  %v1081_v44 = vcvt.s32.f32 %v1079_v41 }
 0x228   : > { %1279 = vmin.xlane.f32.xlu0 %v1278_v31  ;;  %1263 = vmin.xlane.f32.xlu1 %v1262_v37  ;;  %v1065_v31 = vcvt.s32.f32 %v1063_v3  ;;  %v3936_v37 = vld [vmem:[#allocation81_spill] sm:$0xff] }
 0x229   : > { %v3366_v57 = vpop.xlane.xlu0 %1051 }
 0x22a   : > { %vm1053_vm9 = vcmp.eq.f32.partialorder %v2902_v7, %v3366_v57  ;;  %v1289_v7 = vcvt.s32.f32 %v1287_v27 }
 0x22b   : > { %v3370_v59 = vpop.xlane.xlu1 %1035  ;;  %v1054_v0 = vsel %vm1053_vm9, %v1049_v49, inf  ;;  %v1319_v49 = vand.u32 65535, %v3936_v37 }
 0x22c   : > { %1055 = vmin.xlane.f32.xlu0 %v1054_v0  ;;  %vm1037_vm10 = vcmp.eq.f32.partialorder %v3931_v50, %v3370_v59  ;;  %v3937_v0 = vld [vmem:[#allocation80_spill] sm:$0xff] }
 0x22d   : > { %v1038_v4 = vsel %vm1037_vm10, %v1033_v42, inf }
 0x22e   : > { %1039 = vmin.xlane.f32.xlu1 %v1038_v4  ;;  %v1321_v4 = vcvt.s32.f32 %v1319_v49  ;;  %v1143_v49 = vand.u32 65535, %v3228_v20  ;;  %v1399_v20 = vand.u32 65535, %v3248_v17  ;;  %v1159_v17 = vand.u32 65535, %v3278_v28 }
 0x22f   : > { %v3376_v33 = vpop.xlane.xlu0 %1307  ;;  %v3378_v63 = vpop.xlane.xlu1 %1291 }
 0x230   : > { %vm1309_vm14 = vcmp.eq.f32.partialorder %v2976_v9, %v3376_v33  ;;  %vm1293_vm8 = vcmp.eq.f32.partialorder %v3932_v2, %v3378_v63  ;;  %v3935_v9 = vld [vmem:[#allocation5_spill] sm:$0xff] }
 0x231   : > { %v1310_v5 = vsel %vm1309_vm14, %v1305_v52, inf  ;;  %v1294_v51 = vsel %vm1293_vm8, %v1289_v7, inf  ;;  %v1335_v48 = vand.u32 65535, %v3935_v9  ;;  %v1111_v52 = vand.u32 65535, %v3118_v55  ;;  %v3938_v7 = vld [vmem:[#allocation10_spill] sm:$0xff] }
 0x232   : > { %1311 = vmin.xlane.f32.xlu0 %v1310_v5  ;;  %1295 = vmin.xlane.f32.xlu1 %v1294_v51  ;;  %v3939_v5 = vld [vmem:[#allocation9_spill] sm:$0xff] }
 0x233   : > { %v3386_v26 = vpop.xlane.xlu0 %1083  ;;  %v1337_v50 = vcvt.s32.f32 %v1335_v48  ;;  %v1095_v51 = vand.u32 65535, %v3939_v5  ;;  %v1113_v3 = vcvt.s32.f32 %v1111_v52  ;;  %v1161_v5 = vcvt.s32.f32 %v1159_v17 }
 0x234   : > { %vm1085_vm7 = vcmp.eq.f32.partialorder %v3934_v36, %v3386_v26 }
 0x235   : > { %v3390_v35 = vpop.xlane.xlu1 %1067  ;;  %v1086_v19 = vsel %vm1085_vm7, %v1081_v44, inf  ;;  %v1097_v36 = vcvt.s32.f32 %v1095_v51  ;;  %v1415_v51 = vand.u32 65535, %v3283_v14  ;;  %v1558_v14 = vld [vmem:[#allocation3] sm:$0xff] }
 0x236   : > { %1087 = vmin.xlane.f32.xlu0 %v1086_v19  ;;  %vm1069_vm13 = vcmp.eq.f32.partialorder %v3937_v0, %v3390_v35  ;;  %v1351_v19 = vand.u32 65535, %v3189_v34  ;;  %v1127_v0 = vand.u32 65535, %v3230_v62  ;;  %v1383_v62 = vand.u32 65535, %v3263_v10 }
 0x237   : > { %v1070_v42 = vsel %vm1069_vm13, %v1065_v31, inf }
 0x238   : > { %1071 = vmin.xlane.f32.xlu1 %v1070_v42 }
 0x23a   : > { %v3396_v15 = vpop.xlane.xlu0 %1339  ;;  %v3398_v27 = vpop.xlane.xlu1 %1323 }
 0x23b   : > { %vm1341_vm5 = vcmp.eq.f32.partialorder %v3104_v6, %v3396_v15  ;;  %vm1325_vm3 = vcmp.eq.f32.partialorder %v3938_v7, %v3398_v27  ;;  %v1367_v6 = vand.u32 65535, %v3187_v22 }
 0x23c   : > { %v1342_v41 = vsel %vm1341_vm5, %v1337_v50, inf  ;;  %v1326_v2 = vsel %vm1325_vm3, %v1321_v4, inf  ;;  %v1145_v50 = vcvt.s32.f32 %v1143_v49  ;;  %v1129_v4 = vcvt.s32.f32 %v1127_v0 }
 0x23d   : > { %1343 = vmin.xlane.f32.xlu0 %v1342_v41  ;;  %1327 = vmin.xlane.f32.xlu1 %v1326_v2  ;;  %v1369_v37 = vcvt.s32.f32 %v1367_v6  ;;  %v1401_v41 = vcvt.s32.f32 %v1399_v20  ;;  %v1385_v2 = vcvt.s32.f32 %v1383_v62  ;;  %v3943_v62 = vld [vmem:[#allocation20_spill] sm:$0xff] }
 0x23f   : > { %v3406_v53 = vpop.xlane.xlu0 %1115 }
 0x240   : > { %vm1117_vm2 = vcmp.eq.f32.partialorder %v3152_v60, %v3406_v53  ;;  %v1353_v60 = vcvt.s32.f32 %v1351_v19 }
 0x241   : > { %v3410_v44 = vpop.xlane.xlu1 %1099  ;;  %v1118_v55 = vsel %vm1117_vm2, %v1113_v3, inf }
 0x242   : > { %1119 = vmin.xlane.f32.xlu0 %v1118_v55  ;;  %vm1101_vm0 = vcmp.eq.f32.partialorder %v3182_v40, %v3410_v44  ;;  %v930_v55 = vcvt.f32.s32 %v3295_v29  ;;  %v1574_v29 = vld [vmem:[#allocation3 + $0x80] sm:$0xff] }
 0x243   : > { %v1102_v31 = vsel %vm1101_vm0, %v1097_v36, inf }
 0x244   : > { %1103 = vmin.xlane.f32.xlu1 %v1102_v31  ;;  %v931_v6 = vshll.u32 %v930_v55, 16  ;;  %v1186_v31 = vcvt.f32.s32 %v3300_v8  ;;  %v1559_v55 = vld [vmem:[#allocation3 + $0x8] sm:$0xff] }
 0x245   : > { %v3416_v9 = vpop.xlane.xlu0 %1371  ;;  %v3418_v48 = vpop.xlane.xlu1 %1355 }
 0x246   : > { %vm1373_vm6 = vcmp.eq.f32.partialorder %v3224_v54, %v3416_v9  ;;  %vm1357_vm4 = vcmp.eq.f32.partialorder %v3226_v21, %v3418_v48 }
 0x247   : > { %v1374_v22 = vsel %vm1373_vm6, %v1369_v37, inf  ;;  %v1358_v40 = vsel %vm1357_vm4, %v1353_v60, inf  ;;  %v3940_v37 = vld [vmem:[#allocation16_spill] sm:$0xff]  ;;  %v3941_v60 = vld [vmem:[#allocation15_spill] sm:$0xff] }
 0x248   : > { %1375 = vmin.xlane.f32.xlu0 %v1374_v22  ;;  %1359 = vmin.xlane.f32.xlu1 %v1358_v40  ;;  %vm3942_vm13 = vcmp.gt.f32.partialorder %v3940_v37, %v3941_v60  ;;  %v962_v22 = vcvt.f32.s32 %v3306_v16  ;;  %v1560_v16 = vld [vmem:[#allocation3 + $0x10] sm:$0xff] }
 0x249   : > { %v3426_v34 = vpop.xlane.xlu0 %1147  ;;  %v3428_v42 = vpop.xlane.xlu1 %1131 }
 0x24a   : > { %vm1149_vm12 = vcmp.eq.f32.partialorder %v3258_v47, %v3426_v34  ;;  %vm1133_vm9 = vcmp.eq.f32.partialorder %v3260_v1, %v3428_v42  ;;  %v963_v8 = vshll.u32 %v962_v22, 16  ;;  %v1575_v22 = vld [vmem:[#allocation3 + $0x88] sm:$0xff] }
 0x24b   : > { %v1150_v21 = vsel %vm1149_vm12, %v1145_v50, inf  ;;  %v1134_v54 = vsel %vm1133_vm9, %v1129_v4, inf  ;;  %v946_v4 = vcvt.f32.s32 %v3310_v46 }
 0x24c   : > { %1151 = vmin.xlane.f32.xlu0 %v1150_v21  ;;  %1135 = vmin.xlane.f32.xlu1 %v1134_v54  ;;  %v3944_v21 = vld [vmem:[#allocation18_spill] sm:$0xff] }
 0x24d   : > { %v3436_v52 = vpop.xlane.xlu0 %1403  ;;  %v3438_v7 = vpop.xlane.xlu1 %1387  ;;  %vm3945_vm5 = vcmp.gt.f32.partialorder %v3943_v62, %v3944_v21  ;;  %v3953_v62 = vld [vmem:[#allocation26_spill] sm:$0xff] }
 0x24e   : > { %vm1405_vm10 = vcmp.eq.f32.partialorder %v3276_v18, %v3436_v52  ;;  %vm1389_vm14 = vcmp.eq.f32.partialorder %v3280_v43, %v3438_v7  ;;  %v1417_v18 = vcvt.s32.f32 %v1415_v51 }
 0x24f   : > { %v1406_v10 = vsel %vm1405_vm10, %v1401_v41, inf  ;;  %v1390_v47 = vsel %vm1389_vm14, %v1385_v2, inf  ;;  %v1218_v2 = vcvt.f32.s32 %v3316_v11  ;;  %v994_v11 = vcvt.f32.s32 %v3326_v23 }
 0x250   : > { %1407 = vmin.xlane.f32.xlu0 %v1406_v10  ;;  %1391 = vmin.xlane.f32.xlu1 %v1390_v47  ;;  %v947_v47 = vshll.u32 %v946_v4, 16 }
 0x251   : > { %v3445_v1 = vpop.xlane.xlu1 %1163 }
 0x252   : > { %vm1165_vm8 = vcmp.eq.f32.partialorder %v3287_v39, %v3445_v1 }
 0x253   : > { %v1166_v3 = vsel %vm1165_vm8, %v1161_v5, inf  ;;  %v1202_v5 = vcvt.f32.s32 %v3318_v56  ;;  %v3950_v56 = vld [vmem:[#allocation22_spill] sm:$0xff] }
 0x254   : > { %1167 = vmin.xlane.f32.xlu1 %v1166_v3  ;;  %v3946_v3 = vld [vmem:[#allocation25_spill] sm:$0xff] }
 0x255   : > { %v3450_v28 = vpop.xlane.xlu1 %1419 }
 0x256   : > { %vm1421_vm7 = vcmp.eq.f32.partialorder %v3291_v30, %v3450_v28  ;;  %v1187_v30 = vshll.u32 %v1186_v31, 16  ;;  %v1203_v31 = vshll.u32 %v1202_v5, 16  ;;  %v1234_v5 = vcvt.f32.s32 %v3341_v38  ;;  %v3961_v38 = vld [vmem:[#allocation30_spill] sm:$0xff] }
 0x257   : > { %v1422_v43 = vsel %vm1421_vm7, %v1417_v18, inf  ;;  %v3947_v18 = vld [vmem:[#allocation23_spill] sm:$0xff] }
 0x258   : > { %1423 = vmin.xlane.f32.xlu1 %v1422_v43  ;;  %vm3948_vm3 = vcmp.gt.f32.partialorder %v3946_v3, %v3947_v18 }
 0x28b   : > { %v928_v36 = vpop.xlane.xlu0 %927 }
 0x28c   : > { %v929_v19 = vcvt.f32.s32 %v928_v36 }
 0x28e   : > { %v932_v39 = vadd.s32 %v931_v6, %v929_v19  ;;  %v1219_v6 = vshll.u32 %v1218_v2, 16 }
 0x290   : > { %v1590_v49 = vsel %vm3942_vm13, %v932_v39, %v1558_v14  ;;  %v3949_v39 = vld [vmem:[#allocation24_spill] sm:$0xff] }
 0x291   : > { %1622 = vst.msk [vmem:[#allocation3] sm:$0xff] %vm231_vm1, %v1590_v49  ;;  %vm3951_vm2 = vcmp.gt.f32.partialorder %v3949_v39, %v3950_v56  ;;  %v3962_v39 = vld [vmem:[#allocation28_spill] sm:$0xff] }
 0x292   : > { %v1184_v0 = vpop.xlane.xlu0 %1183  ;;  %vm3963_vm12 = vcmp.gt.f32.partialorder %v3961_v38, %v3962_v39  ;;  %v1580_v39 = vld [vmem:[#allocation3 + $0xb0] sm:$0xff] }
 0x293   : > { %v1185_v40 = vcvt.f32.s32 %v1184_v0 }
 0x295   : > { %v1188_v50 = vadd.s32 %v1187_v30, %v1185_v40  ;;  %v1576_v30 = vld [vmem:[#allocation3 + $0x90] sm:$0xff]  ;;  %v978_v40 = vcvt.f32.s32 %v3331_v12  ;;  %v1562_v12 = vld [vmem:[#allocation3 + $0x20] sm:$0xff] }
 0x296   : > { %v960_v20 = vpop.xlane.xlu0 %959 }
 0x297   : > { %v1606_v54 = vsel %vm3945_vm5, %v1188_v50, %v1574_v29  ;;  %v961_v41 = vcvt.f32.s32 %v960_v20  ;;  %v995_v50 = vshll.u32 %v994_v11, 16  ;;  %v1250_v20 = vcvt.f32.s32 %v3336_v32 }
 0x298   : > { %1638 = vst.msk [vmem:[#allocation3 + $0x80] sm:$0xff] %vm231_vm1, %v1606_v54  ;;  %v1657_v17 = vld [vmem:[#allocation3] sm:$0xff]  ;;  %v944_v10 = vpop.xlane.xlu1 %943  ;;  %v3955_v54 = vld [vmem:[#allocation19_spill] sm:$0xff] }
 0x299   : > { %v964_v46 = vadd.s32 %v963_v8, %v961_v41  ;;  %1689 = vst.msk [vmem:[%s3466_s24] sm:$0xff] %vm231_vm1, %v1657_v17  ;;  %v945_v51 = vcvt.f32.s32 %v944_v10  ;;  %v3952_v8 = vld [vmem:[#allocation29_spill] sm:$0xff]  ;;  %v979_v10 = vshll.u32 %v978_v40, 16  ;;  %v1251_v18 = vshll.u32 %v1250_v20, 16 }
 0x29a   : > { %vm3954_vm0 = vcmp.gt.f32.partialorder %v3952_v8, %v3953_v62  ;;  %v3956_v41 = vld [vmem:[#allocation17_spill] sm:$0xff] }
 0x29b   : > { %v1592_v43 = vsel %vm3948_vm3, %v964_v46, %v1560_v16  ;;  %v948_v36 = vadd.s32 %v947_v47, %v945_v51  ;;  %vm3957_vm6 = vcmp.gt.f32.partialorder %v3955_v54, %v3956_v41  ;;  %v1561_v51 = vld [vmem:[#allocation3 + $0x18] sm:$0xff]  ;;  %v3967_v54 = vld [vmem:[#allocation33_spill] sm:$0xff] }
 0x29c   : > { %1624 = vst.msk [vmem:[#allocation3 + $0x10] sm:$0xff] %vm231_vm1, %v1592_v43  ;;  %v1216_v19 = vpop.xlane.xlu0 %1215  ;;  %v1200_v14 = vpop.xlane.xlu1 %1199  ;;  %v3968_v41 = vld [vmem:[#allocation31_spill] sm:$0xff] }
 0x29d   : > { %v1591_v37 = vsel %vm3951_vm2, %v948_v36, %v1559_v55  ;;  %v1217_v60 = vcvt.f32.s32 %v1216_v19  ;;  %v1201_v49 = vcvt.f32.s32 %v1200_v14  ;;  %v3958_v55 = vld [vmem:[#allocation34_spill] sm:$0xff]  ;;  %v3959_v36 = vld [vmem:[#allocation32_spill] sm:$0xff]  ;;  %vm3969_vm10 = vcmp.gt.f32.partialorder %v3967_v54, %v3968_v41 }
 0x29e   : > { %1623 = vst.msk [vmem:[#allocation3 + $0x8] sm:$0xff] %vm231_vm1, %v1591_v37  ;;  %vm3960_vm4 = vcmp.gt.f32.partialorder %v3958_v55, %v3959_v36  ;;  %v1578_v14 = vld [vmem:[#allocation3 + $0xa0] sm:$0xff]  ;;  %v3974_v55 = vld [vmem:[#allocation37_spill] sm:$0xff] }
 0x29f   : > { %v1673_v0 = vld [vmem:[#allocation3 + $0x80] sm:$0xff]  ;;  %v1220_v23 = vadd.s32 %v1219_v6, %v1217_v60  ;;  %v1204_v29 = vadd.s32 %v1203_v31, %v1201_v49  ;;  %v1026_v31 = vcvt.f32.s32 %v3346_v45  ;;  %v1235_v49 = vshll.u32 %v1234_v5, 16 }
 0x2a0   : > { %1705 = vst.msk [vmem:[%s3466_s24 + $0x80] sm:$0xff] %vm231_vm1, %v1673_v0  ;;  %v992_v4 = vpop.xlane.xlu0 %991  ;;  %v1010_v0 = vcvt.f32.s32 %v3348_v58 }
 0x2a1   : > { %v1608_v21 = vsel %vm3954_vm0, %v1220_v23, %v1576_v30  ;;  %v1607_v16 = vsel %vm3957_vm6, %v1204_v29, %v1575_v22  ;;  %v993_v2 = vcvt.f32.s32 %v992_v4  ;;  %v3964_v23 = vld [vmem:[#allocation38_spill] sm:$0xff]  ;;  %v3965_v29 = vld [vmem:[#allocation36_spill] sm:$0xff]  ;;  %v1577_v4 = vld [vmem:[#allocation3 + $0x98] sm:$0xff]  ;;  %v1027_v58 = vshll.u32 %v1026_v31, 16 }
 0x2a2   : > { %1640 = vst.msk [vmem:[#allocation3 + $0x90] sm:$0xff] %vm231_vm1, %v1608_v21  ;;  %1639 = vst.msk [vmem:[#allocation3 + $0x88] sm:$0xff] %vm231_vm1, %v1607_v16  ;;  %vm3966_vm9 = vcmp.gt.f32.partialorder %v3964_v23, %v3965_v29  ;;  %v1011_v21 = vshll.u32 %v1010_v0, 16  ;;  %v3977_v23 = vld [vmem:[#allocation46_spill] sm:$0xff] }
 0x2a3   : > { %v1659_v17 = vld [vmem:[#allocation3 + $0x10] sm:$0xff]  ;;  %v976_v46 = vpop.xlane.xlu1 %975  ;;  %v996_v32 = vadd.s32 %v995_v50, %v993_v2 }
 0x2a4   : > { %1691 = vst.msk [vmem:[%s3466_s24 + $0x10] sm:$0xff] %vm231_vm1, %v1659_v17  ;;  %v977_v47 = vcvt.f32.s32 %v976_v46  ;;  %v1248_v3 = vpop.xlane.xlu0 %1247  ;;  %v1564_v2 = vld [vmem:[#allocation3 + $0x30] sm:$0xff] }
 0x2a5   : > { %v1658_v43 = vld [vmem:[#allocation3 + $0x8] sm:$0xff]  ;;  %v1594_v6 = vsel %vm3960_vm4, %v996_v32, %v1562_v12  ;;  %v1249_v19 = vcvt.f32.s32 %v1248_v3  ;;  %v1282_v12 = vcvt.f32.s32 %v3356_v25  ;;  %v3973_v25 = vld [vmem:[#allocation39_spill] sm:$0xff] }
 0x2a6   : > { %v980_v11 = vadd.s32 %v979_v10, %v977_v47  ;;  %1690 = vst.msk [vmem:[%s3466_s24 + $0x8] sm:$0xff] %vm231_vm1, %v1658_v43  ;;  %1626 = vst.msk [vmem:[#allocation3 + $0x20] sm:$0xff] %vm231_vm1, %v1594_v6  ;;  %v1563_v32 = vld [vmem:[#allocation3 + $0x28] sm:$0xff]  ;;  %v1266_v47 = vcvt.f32.s32 %v3359_v24  ;;  %vm3975_vm8 = vcmp.gt.f32.partialorder %v3973_v25, %v3974_v55  ;;  %v1058_v24 = vcvt.f32.s32 %v3366_v57 }
 0x2a7   : > { %v1252_v37 = vadd.s32 %v1251_v18, %v1249_v19  ;;  %v1232_v60 = vpop.xlane.xlu1 %1231  ;;  %v3970_v3 = vld [vmem:[#allocation45_spill] sm:$0xff]  ;;  %v3971_v18 = vld [vmem:[#allocation43_spill] sm:$0xff] }
 0x2a8   : > { %v1593_v56 = vsel %vm3963_vm12, %v980_v11, %v1561_v51  ;;  %v1233_v30 = vcvt.f32.s32 %v1232_v60  ;;  %vm3972_vm14 = vcmp.gt.f32.partialorder %v3970_v3, %v3971_v18  ;;  %v1283_v11 = vshll.u32 %v1282_v12, 16  ;;  %v3985_v3 = vld [vmem:[#allocation49_spill] sm:$0xff]  ;;  %v3986_v18 = vld [vmem:[#allocation47_spill] sm:$0xff] }
 0x2a9   : > { %1625 = vst.msk [vmem:[#allocation3 + $0x18] sm:$0xff] %vm231_vm1, %v1593_v56  ;;  %v1675_v22 = vld [vmem:[#allocation3 + $0x90] sm:$0xff]  ;;  %v1674_v40 = vld [vmem:[#allocation3 + $0x88] sm:$0xff]  ;;  %v1610_v50 = vsel %vm3966_vm9, %v1252_v37, %v1578_v14  ;;  %v1267_v38 = vshll.u32 %v1266_v47, 16  ;;  %v1042_v37 = vcvt.f32.s32 %v3370_v59  ;;  %v1059_v57 = vshll.u32 %v1058_v24, 16  ;;  %v3979_v59 = vld [vmem:[#allocation44_spill] sm:$0xff] }
 0x2aa   : > { %1707 = vst.msk [vmem:[%s3466_s24 + $0x90] sm:$0xff] %vm231_vm1, %v1675_v22  ;;  %1706 = vst.msk [vmem:[%s3466_s24 + $0x88] sm:$0xff] %vm231_vm1, %v1674_v40  ;;  %v1236_v45 = vadd.s32 %v1235_v49, %v1233_v30  ;;  %v1024_v20 = vpop.xlane.xlu0 %1023  ;;  %v1579_v49 = vld [vmem:[#allocation3 + $0xa8] sm:$0xff]  ;;  %v3976_v40 = vld [vmem:[#allocation48_spill] sm:$0xff]  ;;  %vm3987_vm3 = vcmp.gt.f32.partialorder %v3985_v3, %v3986_v18 }
 0x2ab   : > { %1642 = vst.msk [vmem:[#allocation3 + $0xa0] sm:$0xff] %vm231_vm1, %v1610_v50  ;;  %v1025_v8 = vcvt.f32.s32 %v1024_v20  ;;  %v1008_v62 = vpop.xlane.xlu1 %1007  ;;  %vm3978_vm7 = vcmp.gt.f32.partialorder %v3976_v40, %v3977_v23  ;;  %v3980_v20 = vld [vmem:[#allocation42_spill] sm:$0xff]  ;;  %v4000_v18 = vld [vmem:[#allocation64_spill] sm:$0xff] }
 0x2ac   : > { %v1609_v16 = vsel %vm3969_vm10, %v1236_v45, %v1577_v4  ;;  %v1009_v17 = vcvt.f32.s32 %v1008_v62  ;;  %v1314_v4 = vcvt.f32.s32 %v3376_v33  ;;  %v1298_v45 = vcvt.f32.s32 %v3378_v63  ;;  %v1565_v33 = vld [vmem:[#allocation3 + $0x38] sm:$0xff]  ;;  %v3982_v63 = vld [vmem:[#allocation53_spill] sm:$0xff] }
 0x2ad   : > { %v1661_v46 = vld [vmem:[#allocation3 + $0x20] sm:$0xff]  ;;  %1641 = vst.msk [vmem:[#allocation3 + $0x98] sm:$0xff] %vm231_vm1, %v1609_v16  ;;  %v1028_v10 = vadd.s32 %v1027_v58, %v1025_v8  ;;  %vm3981_vm13 = vcmp.gt.f32.partialorder %v3979_v59, %v3980_v20  ;;  %v3994_v20 = vld [vmem:[#allocation61_spill] sm:$0xff] }
 0x2ae   : > { %1693 = vst.msk [vmem:[%s3466_s24 + $0x20] sm:$0xff] %vm231_vm1, %v1661_v46  ;;  %v1012_v5 = vadd.s32 %v1011_v21, %v1009_v17  ;;  %v1566_v8 = vld [vmem:[#allocation3 + $0x40] sm:$0xff]  ;;  %v1043_v21 = vshll.u32 %v1042_v37, 16 }
 0x2af   : > { %v1596_v43 = vsel %vm3972_vm14, %v1028_v10, %v1564_v2  ;;  %v3983_v17 = vld [vmem:[#allocation52_spill] sm:$0xff]  ;;  %v1315_v10 = vshll.u32 %v1314_v4, 16 }
 0x2b0   : > { %v1660_v51 = vld [vmem:[#allocation3 + $0x18] sm:$0xff]  ;;  %1628 = vst.msk [vmem:[#allocation3 + $0x30] sm:$0xff] %vm231_vm1, %v1596_v43  ;;  %v1595_v36 = vsel %vm3975_vm8, %v1012_v5, %v1563_v32  ;;  %vm3984_vm5 = vcmp.gt.f32.partialorder %v3982_v63, %v3983_v17  ;;  %v1299_v32 = vshll.u32 %v1298_v45, 16  ;;  %v1567_v45 = vld [vmem:[#allocation3 + $0x48] sm:$0xff] }
 0x2b1   : > { %1692 = vst.msk [vmem:[%s3466_s24 + $0x18] sm:$0xff] %vm231_vm1, %v1660_v51  ;;  %v1280_v6 = vpop.xlane.xlu0 %1279  ;;  %1627 = vst.msk [vmem:[#allocation3 + $0x28] sm:$0xff] %vm231_vm1, %v1595_v36  ;;  %v1264_v31 = vpop.xlane.xlu1 %1263  ;;  %v1090_v51 = vcvt.f32.s32 %v3386_v26  ;;  %v1582_v36 = vld [vmem:[#allocation3 + $0xc0] sm:$0xff] }
 0x2b2   : > { %v1677_v19 = vld [vmem:[#allocation3 + $0xa0] sm:$0xff]  ;;  %v1281_v14 = vcvt.f32.s32 %v1280_v6  ;;  %v1265_v56 = vcvt.f32.s32 %v1264_v31  ;;  %v1581_v6 = vld [vmem:[#allocation3 + $0xb8] sm:$0xff] }
 0x2b3   : > { %1709 = vst.msk [vmem:[%s3466_s24 + $0xa0] sm:$0xff] %vm231_vm1, %v1677_v19  ;;  %v1091_v26 = vshll.u32 %v1090_v51, 16 }
 0x2b4   : > { %v1284_v60 = vadd.s32 %v1283_v11, %v1281_v14  ;;  %v1676_v0 = vld [vmem:[#allocation3 + $0x98] sm:$0xff]  ;;  %v1268_v30 = vadd.s32 %v1267_v38, %v1265_v56  ;;  %v1074_v11 = vcvt.f32.s32 %v3390_v35 }
 0x2b5   : > { %v1056_v22 = vpop.xlane.xlu0 %1055  ;;  %1708 = vst.msk [vmem:[%s3466_s24 + $0x98] sm:$0xff] %vm231_vm1, %v1676_v0  ;;  %v3989_v56 = vld [vmem:[#allocation55_spill] sm:$0xff] }
 0x2b6   : > { %v1612_v29 = vsel %vm3978_vm7, %v1284_v60, %v1580_v39  ;;  %v1057_v50 = vcvt.f32.s32 %v1056_v22  ;;  %v1611_v58 = vsel %vm3981_vm13, %v1268_v30, %v1579_v49  ;;  %v3988_v39 = vld [vmem:[#allocation56_spill] sm:$0xff]  ;;  %v3991_v60 = vld [vmem:[#allocation51_spill] sm:$0xff]  ;;  %v3992_v49 = vld [vmem:[#allocation50_spill] sm:$0xff]  ;;  %v1346_v30 = vcvt.f32.s32 %v3396_v15 }
 0x2b7   : > { %1644 = vst.msk [vmem:[#allocation3 + $0xb0] sm:$0xff] %vm231_vm1, %v1612_v29  ;;  %v1040_v62 = vpop.xlane.xlu1 %1039  ;;  %v1663_v54 = vld [vmem:[#allocation3 + $0x30] sm:$0xff]  ;;  %1643 = vst.msk [vmem:[#allocation3 + $0xa8] sm:$0xff] %vm231_vm1, %v1611_v58  ;;  %vm3990_vm2 = vcmp.gt.f32.partialorder %v3988_v39, %v3989_v56  ;;  %vm3993_vm0 = vcmp.gt.f32.partialorder %v3991_v60, %v3992_v49  ;;  %v1330_v22 = vcvt.f32.s32 %v3398_v27  ;;  %v1075_v23 = vshll.u32 %v1074_v11, 16  ;;  %v1569_v56 = vld [vmem:[#allocation3 + $0x58] sm:$0xff] }
 0x2b8   : > { %v1060_v41 = vadd.s32 %v1059_v57, %v1057_v50  ;;  %v1041_v16 = vcvt.f32.s32 %v1040_v62  ;;  %1695 = vst.msk [vmem:[%s3466_s24 + $0x30] sm:$0xff] %vm231_vm1, %v1663_v54  ;;  %v1662_v2 = vld [vmem:[#allocation3 + $0x28] sm:$0xff]  ;;  %v1568_v57 = vld [vmem:[#allocation3 + $0x50] sm:$0xff]  ;;  %v1378_v11 = vcvt.f32.s32 %v3416_v9  ;;  %v4006_v60 = vld [vmem:[#allocation67_spill] sm:$0xff] }
 0x2b9   : > { %1694 = vst.msk [vmem:[%s3466_s24 + $0x28] sm:$0xff] %vm231_vm1, %v1662_v2  ;;  %v3995_v58 = vld [vmem:[#allocation62_spill] sm:$0xff]  ;;  %v1331_v62 = vshll.u32 %v1330_v22, 16  ;;  %v3998_v2 = vld [vmem:[#allocation57_spill] sm:$0xff]  ;;  %v1138_v22 = vcvt.f32.s32 %v3428_v42 }
 0x2ba   : > { %v1598_v12 = vsel %vm3984_vm5, %v1060_v41, %v1566_v8  ;;  %v1044_v46 = vadd.s32 %v1043_v21, %v1041_v16  ;;  %vm3996_vm6 = vcmp.gt.f32.partialorder %v3994_v20, %v3995_v58  ;;  %v1347_v8 = vshll.u32 %v1346_v30, 16  ;;  %v3997_v16 = vld [vmem:[#allocation58_spill] sm:$0xff] }
 0x2bb   : > { %1630 = vst.msk [vmem:[#allocation3 + $0x40] sm:$0xff] %vm231_vm1, %v1598_v12  ;;  %v1312_v47 = vpop.xlane.xlu0 %1311  ;;  %v1296_v5 = vpop.xlane.xlu1 %1295  ;;  %v1122_v41 = vcvt.f32.s32 %v3406_v53  ;;  %vm3999_vm4 = vcmp.gt.f32.partialorder %v3997_v16, %v3998_v2  ;;  %v1584_v12 = vld [vmem:[#allocation3 + $0xd0] sm:$0xff]  ;;  %v1154_v30 = vcvt.f32.s32 %v3426_v34  ;;  %v1586_v34 = vld [vmem:[#allocation3 + $0xe0] sm:$0xff]  ;;  %v4012_v16 = vld [vmem:[#allocation71_spill] sm:$0xff] }
 0x2bc   : > { %v1597_v43 = vsel %vm3987_vm3, %v1044_v46, %v1565_v33  ;;  %v1313_v25 = vcvt.f32.s32 %v1312_v47  ;;  %v1297_v55 = vcvt.f32.s32 %v1296_v5  ;;  %v1583_v46 = vld [vmem:[#allocation3 + $0xc8] sm:$0xff]  ;;  %v4007_v49 = vld [vmem:[#allocation70_spill] sm:$0xff] }
 0x2bd   : > { %1629 = vst.msk [vmem:[#allocation3 + $0x38] sm:$0xff] %vm231_vm1, %v1597_v43  ;;  %v1123_v3 = vshll.u32 %v1122_v41, 16  ;;  %v4001_v43 = vld [vmem:[#allocation63_spill] sm:$0xff]  ;;  %vm4008_vm10 = vcmp.gt.f32.partialorder %v4006_v60, %v4007_v49  ;;  %v4013_v2 = vld [vmem:[#allocation73_spill] sm:$0xff]  ;;  %v4024_v49 = vld [vmem:[#allocation76_spill] sm:$0xff] }
 0x2be   : > { %v1679_v24 = vld [vmem:[#allocation3 + $0xb0] sm:$0xff]  ;;  %v1316_v19 = vadd.s32 %v1315_v10, %v1313_v25  ;;  %v1300_v14 = vadd.s32 %v1299_v32, %v1297_v55  ;;  %v1678_v31 = vld [vmem:[#allocation3 + $0xa8] sm:$0xff]  ;;  %v1106_v10 = vcvt.f32.s32 %v3410_v44  ;;  %vm4002_vm12 = vcmp.gt.f32.partialorder %v4000_v18, %v4001_v43  ;;  %v4003_v55 = vld [vmem:[#allocation60_spill] sm:$0xff] }
 0x2bf   : > { %1711 = vst.msk [vmem:[%s3466_s24 + $0xb0] sm:$0xff] %vm231_vm1, %v1679_v24  ;;  %v1088_v38 = vpop.xlane.xlu0 %1087  ;;  %1710 = vst.msk [vmem:[%s3466_s24 + $0xa8] sm:$0xff] %vm231_vm1, %v1678_v31  ;;  %v1570_v24 = vld [vmem:[#allocation3 + $0x60] sm:$0xff]  ;;  %v1362_v31 = vcvt.f32.s32 %v3418_v48  ;;  %vm4014_vm8 = vcmp.gt.f32.partialorder %v4012_v16, %v4013_v2 }
 0x2c0   : > { %v1614_v37 = vsel %vm3990_vm2, %v1316_v19, %v1582_v36  ;;  %v1613_v0 = vsel %vm3993_vm0, %v1300_v14, %v1581_v6  ;;  %v1089_v35 = vcvt.f32.s32 %v1088_v38  ;;  %v4004_v36 = vld [vmem:[#allocation59_spill] sm:$0xff]  ;;  %v1107_v14 = vshll.u32 %v1106_v10, 16  ;;  %v4017_v43 = vld [vmem:[#allocation4_spill] sm:$0xff] }
 0x2c1   : > { %1646 = vst.msk [vmem:[#allocation3 + $0xc0] sm:$0xff] %vm231_vm1, %v1614_v37  ;;  %1645 = vst.msk [vmem:[#allocation3 + $0xb8] sm:$0xff] %vm231_vm1, %v1613_v0  ;;  %v1072_v40 = vpop.xlane.xlu1 %1071  ;;  %vm4005_vm9 = vcmp.gt.f32.partialorder %v4003_v55, %v4004_v36  ;;  %vm4018_vm13 = vcmp.gt.f32.partialorder %v3009_v13, %v4017_v43  ;;  %v4019_v55 = vld [vmem:[#allocation72_spill] sm:$0xff]  ;;  %v4020_v36 = vld [vmem:[#allocation75_spill] sm:$0xff] }
 0x2c2   : > { %v1665_v29 = vld [vmem:[#allocation3 + $0x40] sm:$0xff]  ;;  %v1092_v50 = vadd.s32 %v1091_v26, %v1089_v35  ;;  %v1073_v4 = vcvt.f32.s32 %v1072_v40  ;;  %v1379_v35 = vshll.u32 %v1378_v11, 16  ;;  %v1363_v40 = vshll.u32 %v1362_v31, 16 }
 0x2c3   : > { %1697 = vst.msk [vmem:[%s3466_s24 + $0x40] sm:$0xff] %vm231_vm1, %v1665_v29  ;;  %v4010_v29 = vld [vmem:[#allocation66_spill] sm:$0xff]  ;;  %vm4021_vm5 = vcmp.gt.f32.partialorder %v4019_v55, %v4020_v36 }
 0x2c4   : > { %v1664_v59 = vld [vmem:[#allocation3 + $0x38] sm:$0xff]  ;;  %v1600_v15 = vsel %vm3996_vm6, %v1092_v50, %v1568_v57  ;;  %v1076_v27 = vadd.s32 %v1075_v23, %v1073_v4  ;;  %v4009_v23 = vld [vmem:[#allocation65_spill] sm:$0xff] }
 0x2c5   : > { %1696 = vst.msk [vmem:[%s3466_s24 + $0x38] sm:$0xff] %vm231_vm1, %v1664_v59  ;;  %1632 = vst.msk [vmem:[#allocation3 + $0x50] sm:$0xff] %vm231_vm1, %v1600_v15  ;;  %vm4011_vm14 = vcmp.gt.f32.partialorder %v4009_v23, %v4010_v29  ;;  %v1585_v59 = vld [vmem:[#allocation3 + $0xd8] sm:$0xff]  ;;  %v4027_v23 = vld [vmem:[#allocation82_spill] sm:$0xff] }
 0x2c6   : > { %v1344_v21 = vpop.xlane.xlu0 %1343  ;;  %v1328_v54 = vpop.xlane.xlu1 %1327  ;;  %v1599_v33 = vsel %vm3999_vm4, %v1076_v27, %v1567_v45  ;;  %v1155_v27 = vshll.u32 %v1154_v30, 16  ;;  %v4028_v29 = vld [vmem:[#allocation7_spill] sm:$0xff] }
 0x2c7   : > { %v1345_v63 = vcvt.f32.s32 %v1344_v21  ;;  %v1329_v17 = vcvt.f32.s32 %v1328_v54  ;;  %1631 = vst.msk [vmem:[#allocation3 + $0x48] sm:$0xff] %vm231_vm1, %v1599_v33  ;;  %v1394_v21 = vcvt.f32.s32 %v3438_v7  ;;  %v1571_v7 = vld [vmem:[#allocation3 + $0x68] sm:$0xff] }
 0x2c8   : > { %v1681_v32 = vld [vmem:[#allocation3 + $0xc0] sm:$0xff]  ;;  %v1680_v47 = vld [vmem:[#allocation3 + $0xb8] sm:$0xff] }
 0x2c9   : > { %v1348_v5 = vadd.s32 %v1347_v8, %v1345_v63  ;;  %v1332_v51 = vadd.s32 %v1331_v62, %v1329_v17  ;;  %1713 = vst.msk [vmem:[%s3466_s24 + $0xc0] sm:$0xff] %vm231_vm1, %v1681_v32  ;;  %1712 = vst.msk [vmem:[%s3466_s24 + $0xb8] sm:$0xff] %vm231_vm1, %v1680_v47  ;;  %v1139_v8 = vshll.u32 %v1138_v22, 16  ;;  %v1410_v62 = vcvt.f32.s32 %v3436_v52  ;;  %v4015_v63 = vld [vmem:[#allocation68_spill] sm:$0xff]  ;;  %v1572_v52 = vld [vmem:[#allocation3 + $0x70] sm:$0xff] }
 0x2ca   : > { %vm4016_vm7 = vcmp.gt.f32.partialorder %v2896_v61, %v4015_v63 }
 0x2cb   : > { %v1120_v53 = vpop.xlane.xlu0 %1119  ;;  %v1616_v25 = vsel %vm4002_vm12, %v1348_v5, %v1584_v12  ;;  %v1615_v6 = vsel %vm4005_vm9, %v1332_v51, %v1583_v46  ;;  %v1411_v5 = vshll.u32 %v1410_v62, 16  ;;  %v1395_v51 = vshll.u32 %v1394_v21, 16 }
 0x2cc   : > { %v1121_v44 = vcvt.f32.s32 %v1120_v53  ;;  %1648 = vst.msk [vmem:[#allocation3 + $0xd0] sm:$0xff] %vm231_vm1, %v1616_v25  ;;  %1647 = vst.msk [vmem:[#allocation3 + $0xc8] sm:$0xff] %vm231_vm1, %v1615_v6  ;;  %v1667_v38 = vld [vmem:[#allocation3 + $0x50] sm:$0xff]  ;;  %v1170_v53 = vcvt.f32.s32 %v3445_v1 }
 0x2cd   : > { %v1104_v19 = vpop.xlane.xlu1 %1103  ;;  %1699 = vst.msk [vmem:[%s3466_s24 + $0x50] sm:$0xff] %vm231_vm1, %v1667_v38  ;;  %v1588_v1 = vld [vmem:[#allocation3 + $0xf0] sm:$0xff]  ;;  %v1426_v38 = vcvt.f32.s32 %v3450_v28  ;;  %v1573_v28 = vld [vmem:[#allocation3 + $0x78] sm:$0xff] }
 0x2ce   : > { %v1124_v26 = vadd.s32 %v1123_v3, %v1121_v44  ;;  %v1105_v39 = vcvt.f32.s32 %v1104_v19  ;;  %v1666_v37 = vld [vmem:[#allocation3 + $0x48] sm:$0xff]  ;;  %v1171_v13 = vshll.u32 %v1170_v53, 16 }
 0x2cf   : > { %1698 = vst.msk [vmem:[%s3466_s24 + $0x48] sm:$0xff] %vm231_vm1, %v1666_v37 }
 0x2d0   : > { %v1602_v9 = vsel %vm4008_vm10, %v1124_v26, %v1570_v24  ;;  %v1108_v0 = vadd.s32 %v1107_v14, %v1105_v39  ;;  %v1587_v24 = vld [vmem:[#allocation3 + $0xe8] sm:$0xff] }
 0x2d1   : > { %1634 = vst.msk [vmem:[#allocation3 + $0x60] sm:$0xff] %vm231_vm1, %v1602_v9  ;;  %v1376_v48 = vpop.xlane.xlu0 %1375  ;;  %v1360_v57 = vpop.xlane.xlu1 %1359  ;;  %v4025_v9 = vld [vmem:[#allocation79_spill] sm:$0xff] }
 0x2d2   : > { %v1601_v50 = vsel %vm4011_vm14, %v1108_v0, %v1569_v56  ;;  %v1377_v4 = vcvt.f32.s32 %v1376_v48  ;;  %v1361_v45 = vcvt.f32.s32 %v1360_v57  ;;  %vm4026_vm3 = vcmp.gt.f32.partialorder %v4024_v49, %v4025_v9 }
 0x2d3   : > { %1633 = vst.msk [vmem:[#allocation3 + $0x58] sm:$0xff] %vm231_vm1, %v1601_v50  ;;  %v1683_v42 = vld [vmem:[#allocation3 + $0xd0] sm:$0xff]  ;;  %v1682_v20 = vld [vmem:[#allocation3 + $0xc8] sm:$0xff]  ;;  %v1427_v48 = vshll.u32 %v1426_v38, 16 }
 0x2d4   : > { %v1380_v58 = vadd.s32 %v1379_v35, %v1377_v4  ;;  %v1364_v15 = vadd.s32 %v1363_v40, %v1361_v45  ;;  %1715 = vst.msk [vmem:[%s3466_s24 + $0xd0] sm:$0xff] %vm231_vm1, %v1683_v42  ;;  %1714 = vst.msk [vmem:[%s3466_s24 + $0xc8] sm:$0xff] %vm231_vm1, %v1682_v20  ;;  %v1589_v45 = vld [vmem:[#allocation3 + $0xf8] sm:$0xff] }
 0x2d5   : > { %v1152_v54 = vpop.xlane.xlu0 %1151  ;;  %v1136_v41 = vpop.xlane.xlu1 %1135 }
 0x2d6   : > { %v1618_v33 = vsel %vm4014_vm8, %v1380_v58, %v1586_v34  ;;  %v1617_v17 = vsel %vm4016_vm7, %v1364_v15, %v1585_v59  ;;  %v1153_v12 = vcvt.f32.s32 %v1152_v54  ;;  %v1137_v46 = vcvt.f32.s32 %v1136_v41 }
 0x2d7   : > { %1650 = vst.msk [vmem:[#allocation3 + $0xe0] sm:$0xff] %vm231_vm1, %v1618_v33  ;;  %1649 = vst.msk [vmem:[#allocation3 + $0xd8] sm:$0xff] %vm231_vm1, %v1617_v17 }
 0x2d8   : > { %v1669_v10 = vld [vmem:[#allocation3 + $0x60] sm:$0xff]  ;;  %v1156_v32 = vadd.s32 %v1155_v27, %v1153_v12  ;;  %v1140_v47 = vadd.s32 %v1139_v8, %v1137_v46 }
 0x2d9   : > { %1701 = vst.msk [vmem:[%s3466_s24 + $0x60] sm:$0xff] %vm231_vm1, %v1669_v10  ;;  %v1408_v61 = vpop.xlane.xlu0 %1407  ;;  %v1392_v3 = vpop.xlane.xlu1 %1391 }
 0x2da   : > { %v1668_v18 = vld [vmem:[#allocation3 + $0x58] sm:$0xff]  ;;  %v1604_v25 = vsel %vm4018_vm13, %v1156_v32, %v1572_v52  ;;  %v1603_v6 = vsel %vm4021_vm5, %v1140_v47, %v1571_v7  ;;  %v1409_v44 = vcvt.f32.s32 %v1408_v61  ;;  %v1393_v11 = vcvt.f32.s32 %v1392_v3 }
 0x2db   : > { %1700 = vst.msk [vmem:[%s3466_s24 + $0x58] sm:$0xff] %vm231_vm1, %v1668_v18  ;;  %1636 = vst.msk [vmem:[#allocation3 + $0x70] sm:$0xff] %vm231_vm1, %v1604_v25 }
 0x2dc   : > { %1635 = vst.msk [vmem:[#allocation3 + $0x68] sm:$0xff] %vm231_vm1, %v1603_v6  ;;  %v1412_v19 = vadd.s32 %v1411_v5, %v1409_v44  ;;  %v1396_v14 = vadd.s32 %v1395_v51, %v1393_v11 }
 0x2dd   : > { %v1168_v31 = vpop.xlane.xlu1 %1167 }
 0x2de   : > { %v1685_v26 = vld [vmem:[#allocation3 + $0xe0] sm:$0xff]  ;;  %v1684_v39 = vld [vmem:[#allocation3 + $0xd8] sm:$0xff]  ;;  %v1620_v60 = vsel %vm1491_vm11, %v1412_v19, %v1588_v1  ;;  %v1619_v0 = vsel %vm4026_vm3, %v1396_v14, %v1587_v24  ;;  %v1169_v35 = vcvt.f32.s32 %v1168_v31  ;;  %vm4029_vm11 = vcmp.gt.f32.partialorder %v4027_v23, %v4028_v29 }
 0x2df   : > { %1717 = vst.msk [vmem:[%s3466_s24 + $0xe0] sm:$0xff] %vm231_vm1, %v1685_v26  ;;  %1716 = vst.msk [vmem:[%s3466_s24 + $0xd8] sm:$0xff] %vm231_vm1, %v1684_v39 }
 0x2e0   : > { %1652 = vst.msk [vmem:[#allocation3 + $0xf0] sm:$0xff] %vm231_vm1, %v1620_v60  ;;  %1651 = vst.msk [vmem:[#allocation3 + $0xe8] sm:$0xff] %vm231_vm1, %v1619_v0  ;;  %v1172_v30 = vadd.s32 %v1171_v13, %v1169_v35 }
 0x2e1   : > { %v1424_v22 = vpop.xlane.xlu1 %1423 }
 0x2e2   : > { %v1671_v57 = vld [vmem:[#allocation3 + $0x70] sm:$0xff]  ;;  %v1605_v50 = vsel %vm4029_vm11, %v1172_v30, %v1573_v28  ;;  %v1425_v4 = vcvt.f32.s32 %v1424_v22 }
 0x2e3   : > { %v1670_v40 = vld [vmem:[#allocation3 + $0x68] sm:$0xff]  ;;  %1703 = vst.msk [vmem:[%s3466_s24 + $0x70] sm:$0xff] %vm231_vm1, %v1671_v57  ;;  %1637 = vst.msk [vmem:[#allocation3 + $0x78] sm:$0xff] %vm231_vm1, %v1605_v50 }
 0x2e4   : > { %1702 = vst.msk [vmem:[%s3466_s24 + $0x68] sm:$0xff] %vm231_vm1, %v1670_v40  ;;  %v1428_v34 = vadd.s32 %v1427_v48, %v1425_v4 }
 0x2e6   : > { %v1621_v15 = vsel %vm1492_vm15, %v1428_v34, %v1589_v45 }
 0x2e7   : > { %v1687_v59 = vld [vmem:[#allocation3 + $0xf0] sm:$0xff]  ;;  %v1686_v42 = vld [vmem:[#allocation3 + $0xe8] sm:$0xff]  ;;  %1653 = vst.msk [vmem:[#allocation3 + $0xf8] sm:$0xff] %vm231_vm1, %v1621_v15 }
 0x2e8   : > { %1719 = vst.msk [vmem:[%s3466_s24 + $0xf0] sm:$0xff] %vm231_vm1, %v1687_v59  ;;  %1718 = vst.msk [vmem:[%s3466_s24 + $0xe8] sm:$0xff] %vm231_vm1, %v1686_v42 }
 0x2ea   : > { %v1672_v27 = vld [vmem:[#allocation3 + $0x78] sm:$0xff] }
 0x2eb   : > { %1704 = vst.msk [vmem:[%s3466_s24 + $0x78] sm:$0xff] %vm231_vm1, %v1672_v27 }
 0x2ee   : > { %v1688_v8 = vld [vmem:[#allocation3 + $0xf8] sm:$0xff] }
 0x2ef   : > { %1720 = vst.msk [vmem:[%s3466_s24 + $0xf8] sm:$0xff] %vm231_vm1, %v1688_v8 }
 0x2f0 PF: > { %s12_s11 = sadd.s32 1, %s1961_s11   ;;  %s4032_s9 = smov %s1957_s10 }
 0x2f1   : > { %p9_p5 = scmp.ge.s32.totalorder %s12_s11, 4   ;;  %s4033_s10 = smov %s4035_s12 }
 0x2f3   :  { %11 = sbr.rel (!%p9_p5) target bundleno = 2 (0x2), region = 69 }

</bundles_post_ra>
